<compile_context>
chip_gen: v7x
topology: tpu7x:2x2x1
jax: 0.10.0
libtpu: 0.0.40
codegen_flags: <defaults>
</compile_context>

<pallas_src>
import functools

import jax
import jax.numpy as jnp
from jax import lax
from jax.experimental import pallas as pl
from jax.experimental.pallas import tpu as pltpu


def _round_up(x, m):
    return (x + m - 1) // m * m


def _pick_bc_tile(bc_pad):
    # Largest lane tile (multiple of 128) that divides the padded BC axis.
    for t in (512, 384, 256, 128):
        if bc_pad % t == 0:
            return t
    return 128


def _std_pool_kernel(x_ref, o_ref, *, kernel_size, stride, out_h, out_w):
    # x_ref: (H, W, bc_tile) VMEM block, o_ref: (OH, OW, bc_tile) VMEM block.
    KH = KW = kernel_size
    inv_n = 1.0 / float(KH * KW)

    def row_body(i, carry):
        si = i * stride
        win = x_ref[pl.ds(si, KH), :, :]              # (KH, W, bct)
        # H reduction done ONCE per output row (shared by all output columns).
        col_sum = jnp.sum(win, axis=0)                # (W, bct)
        col_sq = jnp.sum(win * win, axis=0)           # (W, bct)

        cols = []
        for j in range(out_w):                        # OW is small & static
            sj = j * stride
            s = jnp.sum(col_sum[sj:sj + KW, :], axis=0, keepdims=True)
            sq = jnp.sum(col_sq[sj:sj + KW, :], axis=0, keepdims=True)
            mean = s * inv_n
            var = sq * inv_n - mean * mean
            # Clamp: one-pass E[x^2]-E[x]^2 can go slightly negative in f32.
            cols.append(jnp.sqrt(jnp.maximum(var, 0.0)))
        row = jnp.concatenate(cols, axis=0)           # (OW, bct)

        # Per-row store (lane-dense, bounds live ranges).
        o_ref[pl.ds(i, 1), :, :] = row[None]
        return carry

    lax.fori_loop(0, out_h, row_body, 0, unroll=(out_h <= 8))


def std_pool2d(x, kernel_size=7, stride=3):
    """x: (B, C, H, W) float -> (B, C, OH, OW) float32 population std pooling."""
    B, C, H, W = x.shape
    KH = KW = kernel_size
    OH = (H - KH) // stride + 1
    OW = (W - KW) // stride + 1
    BC = B * C

    BC_pad = _round_up(BC, 128)
    bc_tile = _pick_bc_tile(BC_pad)

    # Relayout to (H, W, BC_pad): B*C on the lane axis, zero-padded to 128x.
    x_t = jnp.transpose(x.reshape(BC, H, W), (1, 2, 0)).astype(jnp.float32)
    if BC_pad != BC:
        x_t = jnp.pad(x_t, ((0, 0), (0, 0), (0, BC_pad - BC)))

    # VMEM budget: double-buffered input + output blocks plus margin,
    # clamped so it is valid on v5e/v6e/v7x alike.
    in_block_bytes = H * W * bc_tile * 4
    out_block_bytes = OH * OW * bc_tile * 4
    vmem_limit = int(
        min(max(2 * (in_block_bytes + out_block_bytes) + (2 << 20), 4 << 20),
            32 << 20))

    kernel = functools.partial(
        _std_pool_kernel,
        kernel_size=kernel_size, stride=stride, out_h=OH, out_w=OW)

    out_t = pl.pallas_call(
        kernel,
        out_shape=jax.ShapeDtypeStruct((OH, OW, BC_pad), jnp.float32),
        grid=(BC_pad // bc_tile,),
        in_specs=[pl.BlockSpec((H, W, bc_tile), lambda b: (0, 0, b))],
        out_specs=pl.BlockSpec((OH, OW, bc_tile), lambda b: (0, 0, b)),
        compiler_params=pltpu.CompilerParams(
            dimension_semantics=("parallel",),
            vmem_limit_bytes=vmem_limit),
    )(x_t)

    # Drop padding lanes, back to NCHW.
    out = out_t[:, :, :BC]
    return jnp.transpose(out, (2, 0, 1)).reshape(B, C, OH, OW)


def _reference_std_pool2d(x, kernel_size=7, stride=3):
    """Pure-JAX reference mirroring the PyTorch module."""
    B, C, H, W = x.shape
    KH = KW = kernel_size
    OH = (H - KH) // stride + 1
    OW = (W - KW) // stride + 1
    out = jnp.zeros((B, C, OH, OW), jnp.float32)
    for i in range(OH):
        for j in range(OW):
            si, sj = i * stride, j * stride
            win = x[:, :, si:si + KH, sj:sj + KW]
            mean = win.mean(axis=(2, 3), keepdims=True)
            var = ((win - mean) ** 2).mean(axis=(2, 3))
            out = out.at[:, :, i, j].set(jnp.sqrt(var))
    return out


if __name__ == "__main__":
    key = jax.random.PRNGKey(0)
    B, C, H, W = 2, 4, 16, 16
    x = jax.random.normal(key, (B, C, H, W), dtype=jnp.float32)

    out = std_pool2d(x, kernel_size=7, stride=3)
    out = jax.block_until_ready(out)

    ref = _reference_std_pool2d(x, kernel_size=7, stride=3)
    assert out.shape == ref.shape == (B, C, 4, 4), out.shape
    assert jnp.allclose(out, ref, atol=1e-4, rtol=1e-4), "mismatch vs reference"

    print("KERNEL_OK")
</pallas_src>

<mosaic_0001>
module attributes {stable_mosaic.version = 11 : i64} {
  func.func @_std_pool_kernel(%arg0: i32, %arg1: memref<16x16x128xf32, #tpu.memory_space<vmem>>, %arg2: memref<4x4x128xf32, #tpu.memory_space<vmem>>) attributes {dimension_semantics = [#tpu.dimension_semantics<parallel>], iteration_bounds = array<i64: 1>, scalar_prefetch = 0 : i64, scratch_operands = 0 : i64, tpu.core_type = #tpu.core_type<tc>, window_params = [{transform_indices = @transform_0, window_bounds = array<i64: 16, 16, 128>}, {transform_indices = @transform_1, window_bounds = array<i64: 4, 4, 128>}]} {
    %c0_i32 = arith.constant 0 : i32
    %c3_i32 = arith.constant 3 : i32
    %0 = arith.muli %c0_i32, %c3_i32 : i32
    %1 = arith.index_cast %0 : i32 to index
    %c0 = arith.constant 0 : index
    %c0_0 = arith.constant 0 : index
    %2 = vector.load %arg1[%1, %c0, %c0_0] : memref<16x16x128xf32, #tpu.memory_space<vmem>>, vector<7x16x128xf32>
    %cst = arith.constant dense<0.000000e+00> : vector<16x128xf32>
    %3 = vector.multi_reduction <add>, %2, %cst [0] : vector<7x16x128xf32> to vector<16x128xf32>
    %4 = arith.mulf %2, %2 : vector<7x16x128xf32>
    %cst_1 = arith.constant dense<0.000000e+00> : vector<16x128xf32>
    %5 = vector.multi_reduction <add>, %4, %cst_1 [0] : vector<7x16x128xf32> to vector<16x128xf32>
    %6 = vector.extract_strided_slice %3 {offsets = [0, 0], sizes = [7, 128], strides = [1, 1]} : vector<16x128xf32> to vector<7x128xf32>
    %cst_2 = arith.constant dense<0.000000e+00> : vector<128xf32>
    %7 = vector.multi_reduction <add>, %6, %cst_2 [0] : vector<7x128xf32> to vector<128xf32>
    %8 = vector.shape_cast %7 : vector<128xf32> to vector<1x128xf32>
    %9 = vector.extract_strided_slice %5 {offsets = [0, 0], sizes = [7, 128], strides = [1, 1]} : vector<16x128xf32> to vector<7x128xf32>
    %cst_3 = arith.constant dense<0.000000e+00> : vector<128xf32>
    %10 = vector.multi_reduction <add>, %9, %cst_3 [0] : vector<7x128xf32> to vector<128xf32>
    %11 = vector.shape_cast %10 : vector<128xf32> to vector<1x128xf32>
    %cst_4 = arith.constant 0.0204081628 : f32
    %12 = vector.broadcast %cst_4 : f32 to vector<1x128xf32>
    %13 = arith.mulf %8, %12 : vector<1x128xf32>
    %cst_5 = arith.constant 0.0204081628 : f32
    %14 = vector.broadcast %cst_5 : f32 to vector<1x128xf32>
    %15 = arith.mulf %11, %14 : vector<1x128xf32>
    %16 = arith.mulf %13, %13 : vector<1x128xf32>
    %17 = arith.subf %15, %16 : vector<1x128xf32>
    %cst_6 = arith.constant 0.000000e+00 : f32
    %18 = vector.broadcast %cst_6 : f32 to vector<1x128xf32>
    %19 = arith.maximumf %17, %18 : vector<1x128xf32>
    %20 = math.sqrt %19 : vector<1x128xf32>
    %21 = vector.extract_strided_slice %3 {offsets = [3, 0], sizes = [7, 128], strides = [1, 1]} : vector<16x128xf32> to vector<7x128xf32>
    %cst_7 = arith.constant dense<0.000000e+00> : vector<128xf32>
    %22 = vector.multi_reduction <add>, %21, %cst_7 [0] : vector<7x128xf32> to vector<128xf32>
    %23 = vector.shape_cast %22 : vector<128xf32> to vector<1x128xf32>
    %24 = vector.extract_strided_slice %5 {offsets = [3, 0], sizes = [7, 128], strides = [1, 1]} : vector<16x128xf32> to vector<7x128xf32>
    %cst_8 = arith.constant dense<0.000000e+00> : vector<128xf32>
    %25 = vector.multi_reduction <add>, %24, %cst_8 [0] : vector<7x128xf32> to vector<128xf32>
    %26 = vector.shape_cast %25 : vector<128xf32> to vector<1x128xf32>
    %cst_9 = arith.constant 0.0204081628 : f32
    %27 = vector.broadcast %cst_9 : f32 to vector<1x128xf32>
    %28 = arith.mulf %23, %27 : vector<1x128xf32>
    %cst_10 = arith.constant 0.0204081628 : f32
    %29 = vector.broadcast %cst_10 : f32 to vector<1x128xf32>
    %30 = arith.mulf %26, %29 : vector<1x128xf32>
    %31 = arith.mulf %28, %28 : vector<1x128xf32>
    %32 = arith.subf %30, %31 : vector<1x128xf32>
    %cst_11 = arith.constant 0.000000e+00 : f32
    %33 = vector.broadcast %cst_11 : f32 to vector<1x128xf32>
    %34 = arith.maximumf %32, %33 : vector<1x128xf32>
    %35 = math.sqrt %34 : vector<1x128xf32>
    %36 = vector.extract_strided_slice %3 {offsets = [6, 0], sizes = [7, 128], strides = [1, 1]} : vector<16x128xf32> to vector<7x128xf32>
    %cst_12 = arith.constant dense<0.000000e+00> : vector<128xf32>
    %37 = vector.multi_reduction <add>, %36, %cst_12 [0] : vector<7x128xf32> to vector<128xf32>
    %38 = vector.shape_cast %37 : vector<128xf32> to vector<1x128xf32>
    %39 = vector.extract_strided_slice %5 {offsets = [6, 0], sizes = [7, 128], strides = [1, 1]} : vector<16x128xf32> to vector<7x128xf32>
    %cst_13 = arith.constant dense<0.000000e+00> : vector<128xf32>
    %40 = vector.multi_reduction <add>, %39, %cst_13 [0] : vector<7x128xf32> to vector<128xf32>
    %41 = vector.shape_cast %40 : vector<128xf32> to vector<1x128xf32>
    %cst_14 = arith.constant 0.0204081628 : f32
    %42 = vector.broadcast %cst_14 : f32 to vector<1x128xf32>
    %43 = arith.mulf %38, %42 : vector<1x128xf32>
    %cst_15 = arith.constant 0.0204081628 : f32
    %44 = vector.broadcast %cst_15 : f32 to vector<1x128xf32>
    %45 = arith.mulf %41, %44 : vector<1x128xf32>
    %46 = arith.mulf %43, %43 : vector<1x128xf32>
    %47 = arith.subf %45, %46 : vector<1x128xf32>
    %cst_16 = arith.constant 0.000000e+00 : f32
    %48 = vector.broadcast %cst_16 : f32 to vector<1x128xf32>
    %49 = arith.maximumf %47, %48 : vector<1x128xf32>
    %50 = math.sqrt %49 : vector<1x128xf32>
    %51 = vector.extract_strided_slice %3 {offsets = [9, 0], sizes = [7, 128], strides = [1, 1]} : vector<16x128xf32> to vector<7x128xf32>
    %cst_17 = arith.constant dense<0.000000e+00> : vector<128xf32>
    %52 = vector.multi_reduction <add>, %51, %cst_17 [0] : vector<7x128xf32> to vector<128xf32>
    %53 = vector.shape_cast %52 : vector<128xf32> to vector<1x128xf32>
    %54 = vector.extract_strided_slice %5 {offsets = [9, 0], sizes = [7, 128], strides = [1, 1]} : vector<16x128xf32> to vector<7x128xf32>
    %cst_18 = arith.constant dense<0.000000e+00> : vector<128xf32>
    %55 = vector.multi_reduction <add>, %54, %cst_18 [0] : vector<7x128xf32> to vector<128xf32>
    %56 = vector.shape_cast %55 : vector<128xf32> to vector<1x128xf32>
    %cst_19 = arith.constant 0.0204081628 : f32
    %57 = vector.broadcast %cst_19 : f32 to vector<1x128xf32>
    %58 = arith.mulf %53, %57 : vector<1x128xf32>
    %cst_20 = arith.constant 0.0204081628 : f32
    %59 = vector.broadcast %cst_20 : f32 to vector<1x128xf32>
    %60 = arith.mulf %56, %59 : vector<1x128xf32>
    %61 = arith.mulf %58, %58 : vector<1x128xf32>
    %62 = arith.subf %60, %61 : vector<1x128xf32>
    %cst_21 = arith.constant 0.000000e+00 : f32
    %63 = vector.broadcast %cst_21 : f32 to vector<1x128xf32>
    %64 = arith.maximumf %62, %63 : vector<1x128xf32>
    %65 = math.sqrt %64 : vector<1x128xf32>
    %66 = tpu.concatenate %20, %35, %50, %65 in 0 : vector<1x128xf32>, vector<1x128xf32>, vector<1x128xf32>, vector<1x128xf32> -> vector<4x128xf32>
    %67 = vector.shape_cast %66 : vector<4x128xf32> to vector<1x4x128xf32>
    %68 = arith.index_cast %c0_i32 : i32 to index
    %c0_22 = arith.constant 0 : index
    %c0_23 = arith.constant 0 : index
    %69 = vector.load %arg2[%68, %c0_22, %c0_23] : memref<4x4x128xf32, #tpu.memory_space<vmem>>, vector<1x4x128xf32>
    tpu.vector_store %arg2[%68, %c0_22, %c0_23], %67 {strides = array<i32>} : memref<4x4x128xf32, #tpu.memory_space<vmem>>, vector<1x4x128xf32>,
    %c1_i32 = arith.constant 1 : i32
    %c3_i32_24 = arith.constant 3 : i32
    %70 = arith.muli %c1_i32, %c3_i32_24 : i32
    %71 = arith.index_cast %70 : i32 to index
    %c0_25 = arith.constant 0 : index
    %c0_26 = arith.constant 0 : index
    %72 = vector.load %arg1[%71, %c0_25, %c0_26] : memref<16x16x128xf32, #tpu.memory_space<vmem>>, vector<7x16x128xf32>
    %cst_27 = arith.constant dense<0.000000e+00> : vector<16x128xf32>
    %73 = vector.multi_reduction <add>, %72, %cst_27 [0] : vector<7x16x128xf32> to vector<16x128xf32>
    %74 = arith.mulf %72, %72 : vector<7x16x128xf32>
    %cst_28 = arith.constant dense<0.000000e+00> : vector<16x128xf32>
    %75 = vector.multi_reduction <add>, %74, %cst_28 [0] : vector<7x16x128xf32> to vector<16x128xf32>
    %76 = vector.extract_strided_slice %73 {offsets = [0, 0], sizes = [7, 128], strides = [1, 1]} : vector<16x128xf32> to vector<7x128xf32>
    %cst_29 = arith.constant dense<0.000000e+00> : vector<128xf32>
    %77 = vector.multi_reduction <add>, %76, %cst_29 [0] : vector<7x128xf32> to vector<128xf32>
    %78 = vector.shape_cast %77 : vector<128xf32> to vector<1x128xf32>
    %79 = vector.extract_strided_slice %75 {offsets = [0, 0], sizes = [7, 128], strides = [1, 1]} : vector<16x128xf32> to vector<7x128xf32>
    %cst_30 = arith.constant dense<0.000000e+00> : vector<128xf32>
    %80 = vector.multi_reduction <add>, %79, %cst_30 [0] : vector<7x128xf32> to vector<128xf32>
    %81 = vector.shape_cast %80 : vector<128xf32> to vector<1x128xf32>
    %cst_31 = arith.constant 0.0204081628 : f32
    %82 = vector.broadcast %cst_31 : f32 to vector<1x128xf32>
    %83 = arith.mulf %78, %82 : vector<1x128xf32>
    %cst_32 = arith.constant 0.0204081628 : f32
    %84 = vector.broadcast %cst_32 : f32 to vector<1x128xf32>
    %85 = arith.mulf %81, %84 : vector<1x128xf32>
    %86 = arith.mulf %83, %83 : vector<1x128xf32>
    %87 = arith.subf %85, %86 : vector<1x128xf32>
    %cst_33 = arith.constant 0.000000e+00 : f32
    %88 = vector.broadcast %cst_33 : f32 to vector<1x128xf32>
    %89 = arith.maximumf %87, %88 : vector<1x128xf32>
    %90 = math.sqrt %89 : vector<1x128xf32>
    %91 = vector.extract_strided_slice %73 {offsets = [3, 0], sizes = [7, 128], strides = [1, 1]} : vector<16x128xf32> to vector<7x128xf32>
    %cst_34 = arith.constant dense<0.000000e+00> : vector<128xf32>
    %92 = vector.multi_reduction <add>, %91, %cst_34 [0] : vector<7x128xf32> to vector<128xf32>
    %93 = vector.shape_cast %92 : vector<128xf32> to vector<1x128xf32>
    %94 = vector.extract_strided_slice %75 {offsets = [3, 0], sizes = [7, 128], strides = [1, 1]} : vector<16x128xf32> to vector<7x128xf32>
    %cst_35 = arith.constant dense<0.000000e+00> : vector<128xf32>
    %95 = vector.multi_reduction <add>, %94, %cst_35 [0] : vector<7x128xf32> to vector<128xf32>
    %96 = vector.shape_cast %95 : vector<128xf32> to vector<1x128xf32>
    %cst_36 = arith.constant 0.0204081628 : f32
    %97 = vector.broadcast %cst_36 : f32 to vector<1x128xf32>
    %98 = arith.mulf %93, %97 : vector<1x128xf32>
    %cst_37 = arith.constant 0.0204081628 : f32
    %99 = vector.broadcast %cst_37 : f32 to vector<1x128xf32>
    %100 = arith.mulf %96, %99 : vector<1x128xf32>
    %101 = arith.mulf %98, %98 : vector<1x128xf32>
    %102 = arith.subf %100, %101 : vector<1x128xf32>
    %cst_38 = arith.constant 0.000000e+00 : f32
    %103 = vector.broadcast %cst_38 : f32 to vector<1x128xf32>
    %104 = arith.maximumf %102, %103 : vector<1x128xf32>
    %105 = math.sqrt %104 : vector<1x128xf32>
    %106 = vector.extract_strided_slice %73 {offsets = [6, 0], sizes = [7, 128], strides = [1, 1]} : vector<16x128xf32> to vector<7x128xf32>
    %cst_39 = arith.constant dense<0.000000e+00> : vector<128xf32>
    %107 = vector.multi_reduction <add>, %106, %cst_39 [0] : vector<7x128xf32> to vector<128xf32>
    %108 = vector.shape_cast %107 : vector<128xf32> to vector<1x128xf32>
    %109 = vector.extract_strided_slice %75 {offsets = [6, 0], sizes = [7, 128], strides = [1, 1]} : vector<16x128xf32> to vector<7x128xf32>
    %cst_40 = arith.constant dense<0.000000e+00> : vector<128xf32>
    %110 = vector.multi_reduction <add>, %109, %cst_40 [0] : vector<7x128xf32> to vector<128xf32>
    %111 = vector.shape_cast %110 : vector<128xf32> to vector<1x128xf32>
    %cst_41 = arith.constant 0.0204081628 : f32
    %112 = vector.broadcast %cst_41 : f32 to vector<1x128xf32>
    %113 = arith.mulf %108, %112 : vector<1x128xf32>
    %cst_42 = arith.constant 0.0204081628 : f32
    %114 = vector.broadcast %cst_42 : f32 to vector<1x128xf32>
    %115 = arith.mulf %111, %114 : vector<1x128xf32>
    %116 = arith.mulf %113, %113 : vector<1x128xf32>
    %117 = arith.subf %115, %116 : vector<1x128xf32>
    %cst_43 = arith.constant 0.000000e+00 : f32
    %118 = vector.broadcast %cst_43 : f32 to vector<1x128xf32>
    %119 = arith.maximumf %117, %118 : vector<1x128xf32>
    %120 = math.sqrt %119 : vector<1x128xf32>
    %121 = vector.extract_strided_slice %73 {offsets = [9, 0], sizes = [7, 128], strides = [1, 1]} : vector<16x128xf32> to vector<7x128xf32>
    %cst_44 = arith.constant dense<0.000000e+00> : vector<128xf32>
    %122 = vector.multi_reduction <add>, %121, %cst_44 [0] : vector<7x128xf32> to vector<128xf32>
    %123 = vector.shape_cast %122 : vector<128xf32> to vector<1x128xf32>
    %124 = vector.extract_strided_slice %75 {offsets = [9, 0], sizes = [7, 128], strides = [1, 1]} : vector<16x128xf32> to vector<7x128xf32>
    %cst_45 = arith.constant dense<0.000000e+00> : vector<128xf32>
    %125 = vector.multi_reduction <add>, %124, %cst_45 [0] : vector<7x128xf32> to vector<128xf32>
    %126 = vector.shape_cast %125 : vector<128xf32> to vector<1x128xf32>
    %cst_46 = arith.constant 0.0204081628 : f32
    %127 = vector.broadcast %cst_46 : f32 to vector<1x128xf32>
    %128 = arith.mulf %123, %127 : vector<1x128xf32>
    %cst_47 = arith.constant 0.0204081628 : f32
    %129 = vector.broadcast %cst_47 : f32 to vector<1x128xf32>
    %130 = arith.mulf %126, %129 : vector<1x128xf32>
    %131 = arith.mulf %128, %128 : vector<1x128xf32>
    %132 = arith.subf %130, %131 : vector<1x128xf32>
    %cst_48 = arith.constant 0.000000e+00 : f32
    %133 = vector.broadcast %cst_48 : f32 to vector<1x128xf32>
    %134 = arith.maximumf %132, %133 : vector<1x128xf32>
    %135 = math.sqrt %134 : vector<1x128xf32>
    %136 = tpu.concatenate %90, %105, %120, %135 in 0 : vector<1x128xf32>, vector<1x128xf32>, vector<1x128xf32>, vector<1x128xf32> -> vector<4x128xf32>
    %137 = vector.shape_cast %136 : vector<4x128xf32> to vector<1x4x128xf32>
    %138 = arith.index_cast %c1_i32 : i32 to index
    %c0_49 = arith.constant 0 : index
    %c0_50 = arith.constant 0 : index
    %139 = vector.load %arg2[%138, %c0_49, %c0_50] : memref<4x4x128xf32, #tpu.memory_space<vmem>>, vector<1x4x128xf32>
    tpu.vector_store %arg2[%138, %c0_49, %c0_50], %137 {strides = array<i32>} : memref<4x4x128xf32, #tpu.memory_space<vmem>>, vector<1x4x128xf32>,
    %c2_i32 = arith.constant 2 : i32
    %c3_i32_51 = arith.constant 3 : i32
    %140 = arith.muli %c2_i32, %c3_i32_51 : i32
    %141 = arith.index_cast %140 : i32 to index
    %c0_52 = arith.constant 0 : index
    %c0_53 = arith.constant 0 : index
    %142 = vector.load %arg1[%141, %c0_52, %c0_53] : memref<16x16x128xf32, #tpu.memory_space<vmem>>, vector<7x16x128xf32>
    %cst_54 = arith.constant dense<0.000000e+00> : vector<16x128xf32>
    %143 = vector.multi_reduction <add>, %142, %cst_54 [0] : vector<7x16x128xf32> to vector<16x128xf32>
    %144 = arith.mulf %142, %142 : vector<7x16x128xf32>
    %cst_55 = arith.constant dense<0.000000e+00> : vector<16x128xf32>
    %145 = vector.multi_reduction <add>, %144, %cst_55 [0] : vector<7x16x128xf32> to vector<16x128xf32>
    %146 = vector.extract_strided_slice %143 {offsets = [0, 0], sizes = [7, 128], strides = [1, 1]} : vector<16x128xf32> to vector<7x128xf32>
    %cst_56 = arith.constant dense<0.000000e+00> : vector<128xf32>
    %147 = vector.multi_reduction <add>, %146, %cst_56 [0] : vector<7x128xf32> to vector<128xf32>
    %148 = vector.shape_cast %147 : vector<128xf32> to vector<1x128xf32>
    %149 = vector.extract_strided_slice %145 {offsets = [0, 0], sizes = [7, 128], strides = [1, 1]} : vector<16x128xf32> to vector<7x128xf32>
    %cst_57 = arith.constant dense<0.000000e+00> : vector<128xf32>
    %150 = vector.multi_reduction <add>, %149, %cst_57 [0] : vector<7x128xf32> to vector<128xf32>
    %151 = vector.shape_cast %150 : vector<128xf32> to vector<1x128xf32>
    %cst_58 = arith.constant 0.0204081628 : f32
    %152 = vector.broadcast %cst_58 : f32 to vector<1x128xf32>
    %153 = arith.mulf %148, %152 : vector<1x128xf32>
    %cst_59 = arith.constant 0.0204081628 : f32
    %154 = vector.broadcast %cst_59 : f32 to vector<1x128xf32>
    %155 = arith.mulf %151, %154 : vector<1x128xf32>
    %156 = arith.mulf %153, %153 : vector<1x128xf32>
    %157 = arith.subf %155, %156 : vector<1x128xf32>
    %cst_60 = arith.constant 0.000000e+00 : f32
    %158 = vector.broadcast %cst_60 : f32 to vector<1x128xf32>
    %159 = arith.maximumf %157, %158 : vector<1x128xf32>
    %160 = math.sqrt %159 : vector<1x128xf32>
    %161 = vector.extract_strided_slice %143 {offsets = [3, 0], sizes = [7, 128], strides = [1, 1]} : vector<16x128xf32> to vector<7x128xf32>
    %cst_61 = arith.constant dense<0.000000e+00> : vector<128xf32>
    %162 = vector.multi_reduction <add>, %161, %cst_61 [0] : vector<7x128xf32> to vector<128xf32>
    %163 = vector.shape_cast %162 : vector<128xf32> to vector<1x128xf32>
    %164 = vector.extract_strided_slice %145 {offsets = [3, 0], sizes = [7, 128], strides = [1, 1]} : vector<16x128xf32> to vector<7x128xf32>
    %cst_62 = arith.constant dense<0.000000e+00> : vector<128xf32>
    %165 = vector.multi_reduction <add>, %164, %cst_62 [0] : vector<7x128xf32> to vector<128xf32>
    %166 = vector.shape_cast %165 : vector<128xf32> to vector<1x128xf32>
    %cst_63 = arith.constant 0.0204081628 : f32
    %167 = vector.broadcast %cst_63 : f32 to vector<1x128xf32>
    %168 = arith.mulf %163, %167 : vector<1x128xf32>
    %cst_64 = arith.constant 0.0204081628 : f32
    %169 = vector.broadcast %cst_64 : f32 to vector<1x128xf32>
    %170 = arith.mulf %166, %169 : vector<1x128xf32>
    %171 = arith.mulf %168, %168 : vector<1x128xf32>
    %172 = arith.subf %170, %171 : vector<1x128xf32>
    %cst_65 = arith.constant 0.000000e+00 : f32
    %173 = vector.broadcast %cst_65 : f32 to vector<1x128xf32>
    %174 = arith.maximumf %172, %173 : vector<1x128xf32>
    %175 = math.sqrt %174 : vector<1x128xf32>
    %176 = vector.extract_strided_slice %143 {offsets = [6, 0], sizes = [7, 128], strides = [1, 1]} : vector<16x128xf32> to vector<7x128xf32>
    %cst_66 = arith.constant dense<0.000000e+00> : vector<128xf32>
    %177 = vector.multi_reduction <add>, %176, %cst_66 [0] : vector<7x128xf32> to vector<128xf32>
    %178 = vector.shape_cast %177 : vector<128xf32> to vector<1x128xf32>
    %179 = vector.extract_strided_slice %145 {offsets = [6, 0], sizes = [7, 128], strides = [1, 1]} : vector<16x128xf32> to vector<7x128xf32>
    %cst_67 = arith.constant dense<0.000000e+00> : vector<128xf32>
    %180 = vector.multi_reduction <add>, %179, %cst_67 [0] : vector<7x128xf32> to vector<128xf32>
    %181 = vector.shape_cast %180 : vector<128xf32> to vector<1x128xf32>
    %cst_68 = arith.constant 0.0204081628 : f32
    %182 = vector.broadcast %cst_68 : f32 to vector<1x128xf32>
    %183 = arith.mulf %178, %182 : vector<1x128xf32>
    %cst_69 = arith.constant 0.0204081628 : f32
    %184 = vector.broadcast %cst_69 : f32 to vector<1x128xf32>
    %185 = arith.mulf %181, %184 : vector<1x128xf32>
    %186 = arith.mulf %183, %183 : vector<1x128xf32>
    %187 = arith.subf %185, %186 : vector<1x128xf32>
    %cst_70 = arith.constant 0.000000e+00 : f32
    %188 = vector.broadcast %cst_70 : f32 to vector<1x128xf32>
    %189 = arith.maximumf %187, %188 : vector<1x128xf32>
    %190 = math.sqrt %189 : vector<1x128xf32>
    %191 = vector.extract_strided_slice %143 {offsets = [9, 0], sizes = [7, 128], strides = [1, 1]} : vector<16x128xf32> to vector<7x128xf32>
    %cst_71 = arith.constant dense<0.000000e+00> : vector<128xf32>
    %192 = vector.multi_reduction <add>, %191, %cst_71 [0] : vector<7x128xf32> to vector<128xf32>
    %193 = vector.shape_cast %192 : vector<128xf32> to vector<1x128xf32>
    %194 = vector.extract_strided_slice %145 {offsets = [9, 0], sizes = [7, 128], strides = [1, 1]} : vector<16x128xf32> to vector<7x128xf32>
    %cst_72 = arith.constant dense<0.000000e+00> : vector<128xf32>
    %195 = vector.multi_reduction <add>, %194, %cst_72 [0] : vector<7x128xf32> to vector<128xf32>
    %196 = vector.shape_cast %195 : vector<128xf32> to vector<1x128xf32>
    %cst_73 = arith.constant 0.0204081628 : f32
    %197 = vector.broadcast %cst_73 : f32 to vector<1x128xf32>
    %198 = arith.mulf %193, %197 : vector<1x128xf32>
    %cst_74 = arith.constant 0.0204081628 : f32
    %199 = vector.broadcast %cst_74 : f32 to vector<1x128xf32>
    %200 = arith.mulf %196, %199 : vector<1x128xf32>
    %201 = arith.mulf %198, %198 : vector<1x128xf32>
    %202 = arith.subf %200, %201 : vector<1x128xf32>
    %cst_75 = arith.constant 0.000000e+00 : f32
    %203 = vector.broadcast %cst_75 : f32 to vector<1x128xf32>
    %204 = arith.maximumf %202, %203 : vector<1x128xf32>
    %205 = math.sqrt %204 : vector<1x128xf32>
    %206 = tpu.concatenate %160, %175, %190, %205 in 0 : vector<1x128xf32>, vector<1x128xf32>, vector<1x128xf32>, vector<1x128xf32> -> vector<4x128xf32>
    %207 = vector.shape_cast %206 : vector<4x128xf32> to vector<1x4x128xf32>
    %208 = arith.index_cast %c2_i32 : i32 to index
    %c0_76 = arith.constant 0 : index
    %c0_77 = arith.constant 0 : index
    %209 = vector.load %arg2[%208, %c0_76, %c0_77] : memref<4x4x128xf32, #tpu.memory_space<vmem>>, vector<1x4x128xf32>
    tpu.vector_store %arg2[%208, %c0_76, %c0_77], %207 {strides = array<i32>} : memref<4x4x128xf32, #tpu.memory_space<vmem>>, vector<1x4x128xf32>,
    %c3_i32_78 = arith.constant 3 : i32
    %c3_i32_79 = arith.constant 3 : i32
    %210 = arith.muli %c3_i32_78, %c3_i32_79 : i32
    %211 = arith.index_cast %210 : i32 to index
    %c0_80 = arith.constant 0 : index
    %c0_81 = arith.constant 0 : index
    %212 = vector.load %arg1[%211, %c0_80, %c0_81] : memref<16x16x128xf32, #tpu.memory_space<vmem>>, vector<7x16x128xf32>
    %cst_82 = arith.constant dense<0.000000e+00> : vector<16x128xf32>
    %213 = vector.multi_reduction <add>, %212, %cst_82 [0] : vector<7x16x128xf32> to vector<16x128xf32>
    %214 = arith.mulf %212, %212 : vector<7x16x128xf32>
    %cst_83 = arith.constant dense<0.000000e+00> : vector<16x128xf32>
    %215 = vector.multi_reduction <add>, %214, %cst_83 [0] : vector<7x16x128xf32> to vector<16x128xf32>
    %216 = vector.extract_strided_slice %213 {offsets = [0, 0], sizes = [7, 128], strides = [1, 1]} : vector<16x128xf32> to vector<7x128xf32>
    %cst_84 = arith.constant dense<0.000000e+00> : vector<128xf32>
    %217 = vector.multi_reduction <add>, %216, %cst_84 [0] : vector<7x128xf32> to vector<128xf32>
    %218 = vector.shape_cast %217 : vector<128xf32> to vector<1x128xf32>
    %219 = vector.extract_strided_slice %215 {offsets = [0, 0], sizes = [7, 128], strides = [1, 1]} : vector<16x128xf32> to vector<7x128xf32>
    %cst_85 = arith.constant dense<0.000000e+00> : vector<128xf32>
    %220 = vector.multi_reduction <add>, %219, %cst_85 [0] : vector<7x128xf32> to vector<128xf32>
    %221 = vector.shape_cast %220 : vector<128xf32> to vector<1x128xf32>
    %cst_86 = arith.constant 0.0204081628 : f32
    %222 = vector.broadcast %cst_86 : f32 to vector<1x128xf32>
    %223 = arith.mulf %218, %222 : vector<1x128xf32>
    %cst_87 = arith.constant 0.0204081628 : f32
    %224 = vector.broadcast %cst_87 : f32 to vector<1x128xf32>
    %225 = arith.mulf %221, %224 : vector<1x128xf32>
    %226 = arith.mulf %223, %223 : vector<1x128xf32>
    %227 = arith.subf %225, %226 : vector<1x128xf32>
    %cst_88 = arith.constant 0.000000e+00 : f32
    %228 = vector.broadcast %cst_88 : f32 to vector<1x128xf32>
    %229 = arith.maximumf %227, %228 : vector<1x128xf32>
    %230 = math.sqrt %229 : vector<1x128xf32>
    %231 = vector.extract_strided_slice %213 {offsets = [3, 0], sizes = [7, 128], strides = [1, 1]} : vector<16x128xf32> to vector<7x128xf32>
    %cst_89 = arith.constant dense<0.000000e+00> : vector<128xf32>
    %232 = vector.multi_reduction <add>, %231, %cst_89 [0] : vector<7x128xf32> to vector<128xf32>
    %233 = vector.shape_cast %232 : vector<128xf32> to vector<1x128xf32>
    %234 = vector.extract_strided_slice %215 {offsets = [3, 0], sizes = [7, 128], strides = [1, 1]} : vector<16x128xf32> to vector<7x128xf32>
    %cst_90 = arith.constant dense<0.000000e+00> : vector<128xf32>
    %235 = vector.multi_reduction <add>, %234, %cst_90 [0] : vector<7x128xf32> to vector<128xf32>
    %236 = vector.shape_cast %235 : vector<128xf32> to vector<1x128xf32>
    %cst_91 = arith.constant 0.0204081628 : f32
    %237 = vector.broadcast %cst_91 : f32 to vector<1x128xf32>
    %238 = arith.mulf %233, %237 : vector<1x128xf32>
    %cst_92 = arith.constant 0.0204081628 : f32
    %239 = vector.broadcast %cst_92 : f32 to vector<1x128xf32>
    %240 = arith.mulf %236, %239 : vector<1x128xf32>
    %241 = arith.mulf %238, %238 : vector<1x128xf32>
    %242 = arith.subf %240, %241 : vector<1x128xf32>
    %cst_93 = arith.constant 0.000000e+00 : f32
    %243 = vector.broadcast %cst_93 : f32 to vector<1x128xf32>
    %244 = arith.maximumf %242, %243 : vector<1x128xf32>
    %245 = math.sqrt %244 : vector<1x128xf32>
    %246 = vector.extract_strided_slice %213 {offsets = [6, 0], sizes = [7, 128], strides = [1, 1]} : vector<16x128xf32> to vector<7x128xf32>
    %cst_94 = arith.constant dense<0.000000e+00> : vector<128xf32>
    %247 = vector.multi_reduction <add>, %246, %cst_94 [0] : vector<7x128xf32> to vector<128xf32>
    %248 = vector.shape_cast %247 : vector<128xf32> to vector<1x128xf32>
    %249 = vector.extract_strided_slice %215 {offsets = [6, 0], sizes = [7, 128], strides = [1, 1]} : vector<16x128xf32> to vector<7x128xf32>
    %cst_95 = arith.constant dense<0.000000e+00> : vector<128xf32>
    %250 = vector.multi_reduction <add>, %249, %cst_95 [0] : vector<7x128xf32> to vector<128xf32>
    %251 = vector.shape_cast %250 : vector<128xf32> to vector<1x128xf32>
    %cst_96 = arith.constant 0.0204081628 : f32
    %252 = vector.broadcast %cst_96 : f32 to vector<1x128xf32>
    %253 = arith.mulf %248, %252 : vector<1x128xf32>
    %cst_97 = arith.constant 0.0204081628 : f32
    %254 = vector.broadcast %cst_97 : f32 to vector<1x128xf32>
    %255 = arith.mulf %251, %254 : vector<1x128xf32>
    %256 = arith.mulf %253, %253 : vector<1x128xf32>
    %257 = arith.subf %255, %256 : vector<1x128xf32>
    %cst_98 = arith.constant 0.000000e+00 : f32
    %258 = vector.broadcast %cst_98 : f32 to vector<1x128xf32>
    %259 = arith.maximumf %257, %258 : vector<1x128xf32>
    %260 = math.sqrt %259 : vector<1x128xf32>
    %261 = vector.extract_strided_slice %213 {offsets = [9, 0], sizes = [7, 128], strides = [1, 1]} : vector<16x128xf32> to vector<7x128xf32>
    %cst_99 = arith.constant dense<0.000000e+00> : vector<128xf32>
    %262 = vector.multi_reduction <add>, %261, %cst_99 [0] : vector<7x128xf32> to vector<128xf32>
    %263 = vector.shape_cast %262 : vector<128xf32> to vector<1x128xf32>
    %264 = vector.extract_strided_slice %215 {offsets = [9, 0], sizes = [7, 128], strides = [1, 1]} : vector<16x128xf32> to vector<7x128xf32>
    %cst_100 = arith.constant dense<0.000000e+00> : vector<128xf32>
    %265 = vector.multi_reduction <add>, %264, %cst_100 [0] : vector<7x128xf32> to vector<128xf32>
    %266 = vector.shape_cast %265 : vector<128xf32> to vector<1x128xf32>
    %cst_101 = arith.constant 0.0204081628 : f32
    %267 = vector.broadcast %cst_101 : f32 to vector<1x128xf32>
    %268 = arith.mulf %263, %267 : vector<1x128xf32>
    %cst_102 = arith.constant 0.0204081628 : f32
    %269 = vector.broadcast %cst_102 : f32 to vector<1x128xf32>
    %270 = arith.mulf %266, %269 : vector<1x128xf32>
    %271 = arith.mulf %268, %268 : vector<1x128xf32>
    %272 = arith.subf %270, %271 : vector<1x128xf32>
    %cst_103 = arith.constant 0.000000e+00 : f32
    %273 = vector.broadcast %cst_103 : f32 to vector<1x128xf32>
    %274 = arith.maximumf %272, %273 : vector<1x128xf32>
    %275 = math.sqrt %274 : vector<1x128xf32>
    %276 = tpu.concatenate %230, %245, %260, %275 in 0 : vector<1x128xf32>, vector<1x128xf32>, vector<1x128xf32>, vector<1x128xf32> -> vector<4x128xf32>
    %277 = vector.shape_cast %276 : vector<4x128xf32> to vector<1x4x128xf32>
    %278 = arith.index_cast %c3_i32_78 : i32 to index
    %c0_104 = arith.constant 0 : index
    %c0_105 = arith.constant 0 : index
    %279 = vector.load %arg2[%278, %c0_104, %c0_105] : memref<4x4x128xf32, #tpu.memory_space<vmem>>, vector<1x4x128xf32>
    tpu.vector_store %arg2[%278, %c0_104, %c0_105], %277 {strides = array<i32>} : memref<4x4x128xf32, #tpu.memory_space<vmem>>, vector<1x4x128xf32>,
    %c4_i32 = arith.constant 4 : i32
    return
  }
  func.func @transform_0(%arg0: i32) -> (i32, i32, i32) {
    %c0_i32 = arith.constant 0 : i32
    %c0_i32_0 = arith.constant 0 : i32
    %c0_i32_1 = arith.constant 0 : i32
    return %c0_i32, %c0_i32_0, %arg0 : i32, i32, i32
  }
  func.func @transform_1(%arg0: i32) -> (i32, i32, i32) {
    %c0_i32 = arith.constant 0 : i32
    %c0_i32_0 = arith.constant 0 : i32
    %c0_i32_1 = arith.constant 0 : i32
    return %c0_i32, %c0_i32_0, %arg0 : i32, i32, i32
  }
}

</mosaic_0001>

<bundles_post_ra>
// kernel: tpu_custom_call.1
= control target key start
LH: loop header
LB: loop body
LE: loop exit
PB: predicated region body
PF: predicated region fallthrough
CT: control target
= control target key end

     0   :  { %6 = vsyncpa [#allocation3], 0  ;;  %s1314_s0 = inlined_call_operand.hbm [shape: f32[16,16,128], index: 0, kind: input, shape index: {}]   ;;  %s1315_s1 = inlined_call_operand.hbm [shape: f32[4,4,128], index: 1, kind: output, shape index: {}]  }
   0x1   :  { %7 = vsyncpa [#allocation4], 0  ;;  %s873_s6 = smov [#allocation2]   ;;  %s825_s10 = scalar_lea.hbm %s1314_s0, 4096 }
   0x2   :  { %s13_s7 = sshll.u32 %s873_s6, 4  ;;  %p826_p0 = scmp.ne.s32.totalorder %s1314_s0, %s825_s10  ;;  %s14_s7 = int_to_ptr.vmem [resolvable:$true] %s13_s7 }
   0x3   :  { %p829_p1 = scmp.lt.u32.totalorder %s825_s10, %s1314_s0 }
   0x5   :  { %p831_p2 = pnand %p829_p1, %p826_p0 }
   0x7   :  { %834 = shalt.err (!%p831_p2)
}
   0x8   :  { %s835_s15 = scalar_lea.vmem %s14_s7, 4096  ;;  %p840_p4 = scmp.lt.s32.totalorder %s14_s7, %s14_s7 }
   0x9   :  { %p836_p3 = scmp.ne.s32.totalorder %s14_s7, %s835_s15  ;;  %p841_p5 = scmp.lt.s32.totalorder %s835_s15, %s835_s15 }
   0xb   :  { %p842_p6 = por %p841_p5, %p840_p4 }
   0xd   :  { %p843_p7 = pnand %p842_p6, %p836_p3 }
   0xf   :  { %846 = shalt.err (!%p843_p7)
}
  0x10   :  { %s874_s16 = smov 128   ;;  %s875_s17 = smov 8  }
  0x11   :  { %19 = dma.hbm_to_vmem [thread:$0]  %s1314_s0, 4096, %s14_s7, [#allocation3], %s874_s16, %s874_s16, %s875_s17  }
  0x12   :  { %869 = dma.done.wait [#allocation3], 4096  }
  0x13   :  { %870 = vsyncadd [#allocation3], 4294963200  ;;  %v23_v0 = vld [vmem:[#allocation2] sm:$0xff]  ;;  %v24_v1 = vld [vmem:[#allocation2 + $0x8] sm:$0xff]  ;;  %vm75_vm0 = vcmask 1046528   ;;  %vm104_vm1 = vcmask 1044480  }
  0x14   :  { %v25_v2 = vld [vmem:[#allocation2 + $0x10] sm:$0xff]  ;;  %v26_v3 = vld [vmem:[#allocation2 + $0x18] sm:$0xff]  ;;  %v27_v4 = vld [vmem:[#allocation2 + $0x20] sm:$0xff]  ;;  %v49_v7 = vmul.f32 %v23_v0, %v23_v0  ;;  %v50_v13 = vmul.f32 %v24_v1, %v24_v1  ;;  %vm141_vm2 = vcmask 1041408   ;;  %vm206_vm7 = vcmask 1040384   ;;  %s876_s0 = smov [#allocation5]  }
  0x15   :  { %v28_v5 = vld [vmem:[#allocation2 + $0x28] sm:$0xff]  ;;  %v37_v6 = vadd.f32 %v25_v2, %v23_v0  ;;  %v51_v8 = vmul.f32 %v25_v2, %v25_v2  ;;  %v29_v9 = vld [vmem:[#allocation2 + $0x30] sm:$0xff]  ;;  %v30_v10 = vld [vmem:[#allocation2 + $0x38] sm:$0xff]  ;;  %v43_v12 = vadd.f32 %v26_v3, %v24_v1  ;;  %v52_v14 = vmul.f32 %v26_v3, %v26_v3  ;;  %s775_s20 = sshll.u32 %s876_s0, 4  ;;  %s776_s20 = int_to_ptr.vmem [resolvable:$true] %s775_s20 }
  0x16   :  { %v31_v11 = vld [vmem:[#allocation2 + $0x40] sm:$0xff]  ;;  %v32_v15 = vld [vmem:[#allocation2 + $0x48] sm:$0xff]  ;;  %v53_v17 = vmul.f32 %v27_v4, %v27_v4  ;;  %v33_v18 = vld [vmem:[#allocation2 + $0x50] sm:$0xff]  ;;  %v54_v21 = vmul.f32 %v28_v5, %v28_v5  ;;  %v901_v22 = vmul.f32 %v29_v9, %v29_v9  ;;  %v903_v23 = vmul.f32 %v30_v10, %v30_v10  ;;  %s847_s21 = scalar_lea.vmem %s776_s20, 256  ;;  %p852_p9 = scmp.lt.s32.totalorder %s776_s20, %s776_s20 }
  0x17   :  { %v38_v16 = vadd.f32 %v37_v6, %v27_v4  ;;  %v34_v19 = vld [vmem:[#allocation2 + $0x58] sm:$0xff]  ;;  %v44_v20 = vadd.f32 %v43_v12, %v28_v5  ;;  %v905_v25 = vmul.f32 %v31_v11, %v31_v11  ;;  %v907_v26 = vmul.f32 %v32_v15, %v32_v15  ;;  %v909_v28 = vld [vmem:[#allocation2 + $0x60] sm:$0xff]  ;;  %v911_v29 = vld [vmem:[#allocation2 + $0x68] sm:$0xff]  ;;  %p848_p8 = scmp.ne.s32.totalorder %s776_s20, %s847_s21  ;;  %p853_p10 = scmp.lt.s32.totalorder %s847_s21, %s847_s21 }
  0x18   :  { %v63_v27 = vadd.f32 %v51_v8, %v49_v7  ;;  %v69_v31 = vadd.f32 %v52_v14, %v50_v13  ;;  %v227_v32 = vadd.f32 %v31_v11, %v29_v9  ;;  %v233_v33 = vadd.f32 %v32_v15, %v30_v10  ;;  %v917_v40 = vld [vmem:[#allocation2 + $0x70] sm:$0xff]  ;;  %v919_v41 = vld [vmem:[#allocation2 + $0x78] sm:$0xff]  ;;  %v950_v4 = vld [vmem:[#allocation2 + $0x80] sm:$0xff] }
  0x19   :  { %v39_v24 = vadd.f32 %v38_v16, %v29_v9  ;;  %v45_v30 = vadd.f32 %v44_v20, %v30_v10  ;;  %v913_v35 = vmul.f32 %v33_v18, %v33_v18  ;;  %v915_v36 = vmul.f32 %v34_v19, %v34_v19  ;;  %v952_v5 = vld [vmem:[#allocation2 + $0x88] sm:$0xff]  ;;  %p854_p11 = por %p853_p10, %p852_p9 }
  0x1a   :  { %v64_v37 = vadd.f32 %v63_v27, %v53_v17  ;;  %v70_v39 = vadd.f32 %v69_v31, %v54_v21  ;;  %v228_v42 = vadd.f32 %v227_v32, %v33_v18  ;;  %v234_v43 = vadd.f32 %v233_v33, %v34_v19 }
  0x1b   :  { %v40_v34 = vadd.f32 %v39_v24, %v31_v11  ;;  %v46_v38 = vadd.f32 %v45_v30, %v32_v15  ;;  %v923_v45 = vmul.f32 %v909_v28, %v909_v28  ;;  %v927_v46 = vmul.f32 %v911_v29, %v911_v29  ;;  %p855_p12 = pnand %p854_p11, %p848_p8 }
  0x1c   :  { %v65_v47 = vadd.f32 %v64_v37, %v901_v22  ;;  %v71_v49 = vadd.f32 %v70_v39, %v903_v23  ;;  %v229_v50 = vadd.f32 %v228_v42, %v909_v28  ;;  %v235_v51 = vadd.f32 %v234_v43, %v911_v29 }
  0x1d   :  { %v41_v44 = vadd.f32 %v40_v34, %v33_v18  ;;  %v47_v48 = vadd.f32 %v46_v38, %v34_v19  ;;  %v937_v54 = vmul.f32 %v917_v40, %v917_v40  ;;  %v941_v55 = vmul.f32 %v919_v41, %v919_v41 }
  0x1e   :  { %v66_v53 = vadd.f32 %v65_v47, %v905_v25  ;;  %v72_v57 = vadd.f32 %v71_v49, %v907_v26  ;;  %v230_v58 = vadd.f32 %v229_v50, %v917_v40  ;;  %v236_v59 = vadd.f32 %v235_v51, %v919_v41 }
  0x1f   :  { %v42_v52 = vadd.f32 %v41_v44, %v909_v28  ;;  %v48_v56 = vadd.f32 %v47_v48, %v911_v29  ;;  %vm209_vm12 = vcmask 1042432  }
  0x20   :  { %v67_v60 = vadd.f32 %v66_v53, %v913_v35  ;;  %v73_v0 = vadd.f32 %v72_v57, %v915_v36  ;;  %v956_v8 = vadd.f32 %v230_v58, %v950_v4  ;;  %v959_v9 = vadd.f32 %v236_v59, %v952_v5 }
  0x21   :  { %v76_v61 = vsel %vm75_vm0, %v42_v52, 0.0  ;;  %v105_v62 = vrot.slane %v42_v52, 3  ;;  %v142_v63 = vrot.slane %v42_v52, 6  ;;  %v106_v2 = vrot.slane %v48_v56, 3 }
  0x22   :  { %v77_v1 = vrot.slane %v76_v61, 4  ;;  %v143_v3 = vrot.slane %v48_v56, 6  ;;  %v68_v6 = vadd.f32 %v67_v60, %v923_v45  ;;  %v176_v7 = vrot.slane %v48_v56, 1 }
  0x23   :  { %v74_v10 = vadd.f32 %v73_v0, %v927_v46  ;;  %v107_v12 = vsel %vm104_vm1, %v105_v62, %v106_v2 }
  0x24   :  { %v78_v11 = vadd.f32 %v77_v1, %v76_v61  ;;  %v144_v13 = vsel %vm141_vm2, %v142_v63, %v143_v3  ;;  %v83_v14 = vsel %vm75_vm0, %v68_v6, 0.0  ;;  %v109_v15 = vsel %vm75_vm0, %v107_v12, 0.0 }
  0x25   :  { %v118_v16 = vrot.slane %v68_v6, 3  ;;  %v146_v17 = vsel %vm75_vm0, %v144_v13, 0.0  ;;  %v84_v19 = vrot.slane %v83_v14, 4  ;;  %v110_v20 = vrot.slane %v109_v15, 4 }
  0x26   :  { %v79_v18 = vrot.slane %v78_v11, 2  ;;  %v119_v21 = vrot.slane %v74_v10, 3  ;;  %v147_v24 = vrot.slane %v146_v17, 4  ;;  %v153_v27 = vrot.slane %v68_v6, 6 }
  0x27   :  { %v154_v30 = vrot.slane %v74_v10, 6  ;;  %v178_v31 = vsel %vm75_vm0, %v176_v7, 0.0  ;;  %v85_v33 = vadd.f32 %v84_v19, %v83_v14  ;;  %v111_v34 = vadd.f32 %v110_v20, %v109_v15 }
  0x28   :  { %v80_v32 = vadd.f32 %v79_v18, %v78_v11  ;;  %v120_v37 = vsel %vm104_vm1, %v118_v16, %v119_v21  ;;  %v148_v39 = vadd.f32 %v147_v24, %v146_v17  ;;  %v179_v43 = vrot.slane %v178_v31, 4 }
  0x29   :  { %v122_v38 = vsel %vm75_vm0, %v120_v37, 0.0  ;;  %v155_v42 = vsel %vm141_vm2, %v153_v27, %v154_v30  ;;  %v86_v47 = vrot.slane %v85_v33, 2  ;;  %v112_v48 = vrot.slane %v111_v34, 2 }
  0x2a   :  { %v81_v44 = vrot.slane %v80_v32, 1  ;;  %v123_v49 = vrot.slane %v122_v38, 4  ;;  %v149_v50 = vrot.slane %v148_v39, 2  ;;  %v157_v51 = vsel %vm75_vm0, %v155_v42, 0.0  ;;  %v979_v42 = vld [vmem:[#allocation2 + $0x98] sm:$0xff] }
  0x2b   :  { %v180_v52 = vadd.f32 %v179_v43, %v178_v31  ;;  %v185_v53 = vrot.slane %v74_v10, 1  ;;  %v87_v57 = vadd.f32 %v86_v47, %v85_v33  ;;  %v113_v58 = vadd.f32 %v112_v48, %v111_v34  ;;  %v977_v34 = vld [vmem:[#allocation2 + $0x90] sm:$0xff] }
  0x2c   :  { %v82_v56 = vadd.f32 %v81_v44, %v80_v32  ;;  %v124_v59 = vadd.f32 %v123_v49, %v122_v38  ;;  %v150_v60 = vadd.f32 %v149_v50, %v148_v39  ;;  %v158_v61 = vrot.slane %v157_v51, 4 }
  0x2d   :  { %v181_v62 = vrot.slane %v180_v52, 2  ;;  %v187_v63 = vsel %vm75_vm0, %v185_v53, 0.0  ;;  %v88_v0 = vrot.slane %v87_v57, 1  ;;  %v114_v2 = vrot.slane %v113_v58, 1 }
  0x2e   :  { %v90_v1 = vmul.f32 0.020408163, %v82_v56  ;;  %v125_v3 = vrot.slane %v124_v59, 2  ;;  %v151_v6 = vrot.slane %v150_v60, 1  ;;  %v159_v7 = vadd.f32 %v158_v61, %v157_v51 }
  0x2f   :  { %v182_v11 = vadd.f32 %v181_v62, %v180_v52  ;;  %v188_v12 = vrot.slane %v187_v63, 4  ;;  %v89_v13 = vadd.f32 %v88_v0, %v87_v57  ;;  %v115_v10 = vadd.f32 %v114_v2, %v113_v58 }
  0x30   :  { %v92_v14 = vmul.f32 %v90_v1, %v90_v1  ;;  %v126_v15 = vadd.f32 %v125_v3, %v124_v59  ;;  %v152_v16 = vadd.f32 %v151_v6, %v150_v60  ;;  %v160_v17 = vrot.slane %v159_v7, 2 }
  0x31   :  { %v183_v18 = vrot.slane %v182_v11, 1  ;;  %v189_v19 = vadd.f32 %v188_v12, %v187_v63  ;;  %v91_v20 = vmul.f32 0.020408163, %v89_v13  ;;  %v129_v24 = vmul.f32 0.020408163, %v115_v10 }
  0x32   :  { %v127_v21 = vrot.slane %v126_v15, 1  ;;  %v975_v27 = vmul.f32 %v950_v4, %v950_v4  ;;  %v161_v30 = vadd.f32 %v160_v17, %v159_v7  ;;  %v164_v31 = vmul.f32 0.020408163, %v152_v16 }
  0x33   :  { %v184_v32 = vadd.f32 %v183_v18, %v182_v11  ;;  %v190_v33 = vrot.slane %v189_v19, 2  ;;  %v93_v37 = vsub.f32 %v91_v20, %v92_v14  ;;  %v131_v39 = vmul.f32 %v129_v24, %v129_v24 }
  0x34   :  { %v128_v38 = vadd.f32 %v127_v21, %v126_v15  ;;  %v232_v43 = vadd.f32 %v956_v8, %v977_v34  ;;  %v162_v44 = vrot.slane %v161_v30, 1  ;;  %v238_v49 = vadd.f32 %v959_v9, %v979_v42 }
  0x35   :  { %v191_v47 = vadd.f32 %v190_v33, %v189_v19  ;;  %v194_v48 = vmul.f32 0.020408163, %v184_v32  ;;  %v985_v50 = vmax.f32 %v93_v37, 0.0  ;;  %v253_v52 = vadd.f32 %v905_v25, %v901_v22 }
  0x36   :  { %v130_v51 = vmul.f32 0.020408163, %v128_v38  ;;  %v259_v53 = vadd.f32 %v907_v26, %v903_v23  ;;  %v163_v56 = vadd.f32 %v162_v44, %v161_v30  ;;  %v166_v57 = vmul.f32 %v164_v31, %v164_v31 }
  0x37   :  { %v192_v58 = vrot.slane %v191_v47, 1  ;;  %v265_v8 = vsel %vm75_vm0, %v232_v43, 0.0  ;;  %793 = vrsqrt.f32 %v985_v50  ;;  %v196_v59 = vmul.f32 %v194_v48, %v194_v48 }
  0x38   :  { %v995_v9 = vmul.f32 %v952_v5, %v952_v5  ;;  %v999_v60 = vmul.f32 %v977_v34, %v977_v34  ;;  %v132_v22 = vsub.f32 %v130_v51, %v131_v39  ;;  %v165_v25 = vmul.f32 0.020408163, %v163_v56 }
  0x39   :  { %v193_v61 = vadd.f32 %v192_v58, %v191_v47  ;;  %v254_v23 = vadd.f32 %v253_v52, %v913_v35  ;;  %v260_v26 = vadd.f32 %v259_v53, %v915_v36  ;;  %v266_v62 = vrot.slane %v265_v8, 4 }
  0x3a   :  { %v293_v63 = vrot.slane %v232_v43, 3  ;;  %v294_v0 = vrot.slane %v238_v49, 3  ;;  %v1003_v1 = vmax.f32 %v132_v22, 0.0  ;;  %v167_v2 = vsub.f32 %v165_v25, %v166_v57 }
  0x3b   :  { %v195_v3 = vmul.f32 0.020408163, %v193_v61  ;;  %v255_v6 = vadd.f32 %v254_v23, %v923_v45  ;;  %v1008_v7 = vmul.f32 %v979_v42, %v979_v42  ;;  %v261_v11 = vadd.f32 %v260_v26, %v927_v46 }
  0x3c   :  { %v267_v12 = vadd.f32 %v266_v62, %v265_v8  ;;  %v295_v35 = vsel %vm104_vm1, %v293_v63, %v294_v0  ;;  %vm97_vm3 = vcmp.eq.f32.partialorder %v985_v50, inf  ;;  %vm99_vm4 = vcmp.eq.f32.partialorder %v985_v50, 0.0 }
  0x3d   :  { %795 = vrsqrt.f32 %v1003_v1  ;;  %v329_v36 = vrot.slane %v232_v43, 6  ;;  %v1015_v13 = vmax.f32 %v167_v2, 0.0  ;;  %v197_v14 = vsub.f32 %v195_v3, %v196_v59 }
  0x3e   :  { %v256_v10 = vadd.f32 %v255_v6, %v937_v54  ;;  %v262_v15 = vadd.f32 %v261_v11, %v941_v55  ;;  %v268_v16 = vrot.slane %v267_v12, 2  ;;  %v297_v17 = vsel %vm75_vm0, %v295_v35, 0.0 }
  0x3f   :  { %v330_v18 = vrot.slane %v238_v49, 6  ;;  %v363_v19 = vrot.slane %v238_v49, 1  ;;  %v100_v20 = vand.u32 2147483648, %v985_v50  ;;  %vm136_vm5 = vcmp.eq.f32.partialorder %v1003_v1, inf }
  0x40   :  { %vm138_vm6 = vcmp.eq.f32.partialorder %v1003_v1, 0.0  ;;  %797 = vrsqrt.f32 %v1015_v13  ;;  %v1024_v21 = vmax.f32 %v197_v14, 0.0  ;;  %v257_v24 = vadd.f32 %v256_v10, %v975_v27 }
  0x41   :  { %v263_v30 = vadd.f32 %v262_v15, %v995_v9  ;;  %v269_v31 = vadd.f32 %v268_v16, %v267_v12  ;;  %v794_v32 = vpop.eup %793  ;;  %v139_v33 = vand.u32 2147483648, %v1003_v1  ;;  %vm171_vm8 = vcmp.eq.f32.partialorder %v1015_v13, inf }
  0x42   :  { %v298_v37 = vrot.slane %v297_v17, 4  ;;  %v331_v38 = vsel %vm141_vm2, %v329_v36, %v330_v18  ;;  %v96_v39 = vmul.f32 %v794_v32, %v985_v50  ;;  %vm173_vm9 = vcmp.eq.f32.partialorder %v1015_v13, 0.0 }
  0x43   :  { %v174_v43 = vand.u32 2147483648, %v1015_v13  ;;  %799 = vrsqrt.f32 %v1024_v21  ;;  %v365_v44 = vsel %vm75_vm0, %v363_v19, 0.0  ;;  %v258_v47 = vadd.f32 %v257_v24, %v999_v60 }
  0x44   :  { %v1038_v48 = vadd.f32 %v263_v30, %v1008_v7  ;;  %v270_v49 = vrot.slane %v269_v31, 1  ;;  %v1042_v51 = vadd.f32 %v917_v40, %v909_v28  ;;  %v98_v52 = vsel %vm97_vm3, %v985_v50, %v96_v39 }
  0x45   :  { %vm201_vm10 = vcmp.eq.f32.partialorder %v1024_v21, inf  ;;  %v204_v53 = vand.u32 2147483648, %v1024_v21  ;;  %v299_v56 = vadd.f32 %v298_v37, %v297_v17  ;;  %v333_v57 = vsel %vm75_vm0, %v331_v38, 0.0 }
  0x46   :  { %vm203_vm11 = vcmp.eq.f32.partialorder %v1024_v21, 0.0  ;;  %v271_v58 = vadd.f32 %v270_v49, %v269_v31  ;;  %v272_v8 = vsel %vm75_vm0, %v258_v47, 0.0  ;;  %v306_v59 = vrot.slane %v258_v47, 3 }
  0x47   :  { %v366_v22 = vrot.slane %v365_v44, 4  ;;  %v796_v28 = vpop.eup %795  ;;  %v273_v40 = vrot.slane %v272_v8, 4  ;;  %v300_v25 = vrot.slane %v299_v56, 2  ;;  %v307_v61 = vrot.slane %v1038_v48, 3 }
  0x48   :  { %v334_v23 = vrot.slane %v333_v57, 4  ;;  %v101_v26 = vsel %vm99_vm4, %v100_v20, %v98_v52  ;;  %v135_v62 = vmul.f32 %v796_v28, %v1003_v1  ;;  %v340_v63 = vrot.slane %v258_v47, 6 }
  0x49   :  { %v341_v0 = vrot.slane %v1038_v48, 6  ;;  %v274_v2 = vadd.f32 %v273_v40, %v272_v8  ;;  %v301_v3 = vadd.f32 %v300_v25, %v299_v56  ;;  %v308_v6 = vsel %vm104_vm1, %v306_v59, %v307_v61 }
  0x4a   :  { %v335_v11 = vadd.f32 %v334_v23, %v333_v57  ;;  %v798_v12 = vpop.eup %797  ;;  %v137_v35 = vsel %vm136_vm5, %v1003_v1, %v135_v62  ;;  %v279_v36 = vmul.f32 0.020408163, %v271_v58  ;;  %v310_v14 = vsel %vm75_vm0, %v308_v6, 0.0 }
  0x4b   :  { %v342_v50 = vsel %vm141_vm2, %v340_v63, %v341_v0  ;;  %v140_v10 = vsel %vm138_vm6, %v139_v33, %v137_v35  ;;  %v170_v15 = vmul.f32 %v798_v12, %v1015_v13  ;;  %v275_v16 = vrot.slane %v274_v2, 2 }
  0x4c   :  { %v302_v17 = vrot.slane %v301_v3, 1  ;;  %v207_v18 = vsel %vm206_vm7, %v101_v26, %v140_v10  ;;  %v311_v19 = vrot.slane %v310_v14, 4  ;;  %v336_v20 = vrot.slane %v335_v11, 2 }
  0x4d   :  { %v344_v24 = vsel %vm75_vm0, %v342_v50, 0.0  ;;  %v800_v30 = vpop.eup %799  ;;  %v172_v31 = vsel %vm171_vm8, %v1015_v13, %v170_v15  ;;  %v276_v32 = vadd.f32 %v275_v16, %v274_v2  ;;  %v281_v56 = vmul.f32 %v279_v36, %v279_v36 }
  0x4e   :  { %v303_v37 = vadd.f32 %v302_v17, %v301_v3  ;;  %v345_v38 = vrot.slane %v344_v24, 4  ;;  %v175_v1 = vsel %vm173_vm9, %v174_v43, %v172_v31  ;;  %v200_v33 = vmul.f32 %v800_v30, %v1024_v21 }
  0x4f   :  { %v312_v39 = vadd.f32 %v311_v19, %v310_v14  ;;  %v337_v47 = vadd.f32 %v336_v20, %v335_v11  ;;  %v208_v49 = vsel %vm141_vm2, %v207_v18, %v175_v1  ;;  %v277_v52 = vrot.slane %v276_v32, 1  ;;  %v1095_v19 = vld [vmem:[#allocation2 + $0xa8] sm:$0xff] }
  0x50   :  { %v346_v57 = vadd.f32 %v345_v38, %v344_v24  ;;  %v202_v58 = vsel %vm201_vm10, %v1024_v21, %v200_v33  ;;  %v367_v28 = vadd.f32 %v366_v22, %v365_v44  ;;  %v317_v40 = vmul.f32 0.020408163, %v303_v37  ;;  %v1099_v37 = vld [vmem:[#allocation2 + $0xb8] sm:$0xff] }
  0x51   :  { %v313_v8 = vrot.slane %v312_v39, 2  ;;  %v338_v59 = vrot.slane %v337_v47, 1  ;;  %v205_v13 = vsel %vm203_vm11, %v204_v53, %v202_v58  ;;  %v278_v43 = vadd.f32 %v277_v52, %v276_v32  ;;  %v1097_v32 = vld [vmem:[#allocation2 + $0xb0] sm:$0xff] }
  0x52   :  { %v347_v25 = vrot.slane %v346_v57, 2  ;;  %v210_v61 = vsel %vm209_vm12, %v208_v49, %v205_v13  ;;  %v368_v62 = vrot.slane %v367_v28, 2  ;;  %v372_v2 = vrot.slane %v1038_v48, 1  ;;  %v1088_v48 = vld [vmem:[#allocation2 + $0xa0] sm:$0xff] }
  0x53   :  { %v314_v23 = vadd.f32 %v313_v8, %v312_v39  ;;  %v339_v26 = vadd.f32 %v338_v59, %v337_v47  ;;  %211 = vst [vmem:[#allocation5] sm:$0xf] %v210_v61  ;;  %v280_v63 = vmul.f32 0.020408163, %v278_v43  ;;  %v414_v3 = vadd.f32 %v1042_v51, %v950_v4  ;;  %v1110_v49 = vld [vmem:[#allocation2 + $0xc0] sm:$0xff]  ;;  %v1123_v59 = vld [vmem:[#allocation2 + $0xc8] sm:$0xff] }
  0x54   :  { %v348_v0 = vadd.f32 %v347_v25, %v346_v57  ;;  %v369_v21 = vadd.f32 %v368_v62, %v367_v28  ;;  %v419_v53 = vadd.f32 %v919_v41, %v911_v29  ;;  %v374_v12 = vsel %vm75_vm0, %v372_v2, 0.0 }
  0x55   :  { %v315_v44 = vrot.slane %v314_v23, 1  ;;  %v351_v22 = vmul.f32 0.020408163, %v339_v26  ;;  %v282_v6 = vsub.f32 %v280_v63, %v281_v56  ;;  %v415_v35 = vadd.f32 %v414_v3, %v977_v34 }
  0x56   :  { %v349_v11 = vrot.slane %v348_v0, 1  ;;  %v319_v14 = vmul.f32 %v317_v40, %v317_v40  ;;  %v370_v50 = vrot.slane %v369_v21, 1  ;;  %v375_v10 = vrot.slane %v374_v12, 4 }
  0x57   :  { %v316_v36 = vadd.f32 %v315_v44, %v314_v23  ;;  %v1090_v15 = vmax.f32 %v282_v6, 0.0  ;;  %v416_v51 = vadd.f32 %v415_v35, %v1088_v48  ;;  %v420_v16 = vadd.f32 %v419_v53, %v952_v5 }
  0x58   :  { %v350_v4 = vadd.f32 %v349_v11, %v348_v0  ;;  %v353_v41 = vmul.f32 %v351_v22, %v351_v22  ;;  %v371_v17 = vadd.f32 %v370_v50, %v369_v21  ;;  %v376_v18 = vadd.f32 %v375_v10, %v374_v12 }
  0x59   :  { %v318_v29 = vmul.f32 0.020408163, %v316_v36  ;;  %801 = vrsqrt.f32 %v1090_v15  ;;  %v417_v38 = vadd.f32 %v416_v51, %v1097_v32  ;;  %v421_v5 = vadd.f32 %v420_v16, %v979_v42 }
  0x5a   :  { %v352_v24 = vmul.f32 0.020408163, %v350_v4  ;;  %v377_v30 = vrot.slane %v376_v18, 2  ;;  %v381_v31 = vmul.f32 0.020408163, %v371_v17  ;;  %v1105_v1 = vmul.f32 %v1088_v48, %v1088_v48 }
  0x5b   :  { %v320_v20 = vsub.f32 %v318_v29, %v319_v14  ;;  %vm286_vm13 = vcmp.eq.f32.partialorder %v1090_v15, inf  ;;  %v289_v52 = vand.u32 2147483648, %v1090_v15  ;;  %v422_v56 = vadd.f32 %v421_v5, %v1095_v19 }
  0x5c   :  { %v354_v39 = vsub.f32 %v352_v24, %v353_v41  ;;  %v378_v47 = vadd.f32 %v377_v30, %v376_v18  ;;  %v1116_v57 = vmul.f32 %v1095_v19, %v1095_v19  ;;  %v1120_v58 = vmul.f32 %v1097_v32, %v1097_v32 }
  0x5d   :  { %v1108_v33 = vmax.f32 %v320_v20, 0.0  ;;  %v383_v8 = vmul.f32 %v381_v31, %v381_v31  ;;  %v418_v28 = vadd.f32 %v417_v38, %v1110_v49  ;;  %v1128_v13 = vmul.f32 %v1099_v37, %v1099_v37 }
  0x5e   :  { %vm288_vm14 = vcmp.eq.f32.partialorder %v1090_v15, 0.0  ;;  %v1131_v43 = vmax.f32 %v354_v39, 0.0  ;;  %v379_v40 = vrot.slane %v378_v47, 1  ;;  %v423_v25 = vadd.f32 %v422_v56, %v1099_v37 }
  0x5f   :  { %803 = vrsqrt.f32 %v1108_v33  ;;  %v1136_v61 = vmul.f32 %v1110_v49, %v1110_v49  ;;  %vm324_vm15 = vcmp.eq.f32.partialorder %v1108_v33, inf  ;;  %v439_v23 = vadd.f32 %v937_v54, %v923_v45 }
  0x60   :  { %v445_v26 = vadd.f32 %v941_v55, %v927_v46  ;;  %v451_v62 = vsel %vm75_vm0, %v418_v28, 0.0  ;;  %vm326_vm3 = vcmp.eq.f32.partialorder %v1108_v33, 0.0  ;;  %v327_v63 = vand.u32 2147483648, %v1108_v33 }
  0x61   :  { %805 = vrsqrt.f32 %v1131_v43  ;;  %v1149_v0 = vmul.f32 %v1123_v59, %v1123_v59  ;;  %v380_v2 = vadd.f32 %v379_v40, %v378_v47  ;;  %v1152_v3 = vadd.f32 %v423_v25, %v1123_v59 }
  0x62   :  { %v440_v45 = vadd.f32 %v439_v23, %v975_v27  ;;  %v446_v46 = vadd.f32 %v445_v26, %v995_v9  ;;  %vm358_vm4 = vcmp.eq.f32.partialorder %v1131_v43, inf  ;;  %v452_v55 = vrot.slane %v451_v62, 4 }
  0x63   :  { %v802_v54 = vpop.eup %801  ;;  %v479_v44 = vrot.slane %v418_v28, 3  ;;  %v515_v22 = vrot.slane %v418_v28, 6  ;;  %v382_v53 = vmul.f32 0.020408163, %v380_v2  ;;  %vm360_vm5 = vcmp.eq.f32.partialorder %v1131_v43, 0.0 }
  0x64   :  { %v285_v21 = vmul.f32 %v802_v54, %v1090_v15  ;;  %v441_v6 = vadd.f32 %v440_v45, %v999_v60  ;;  %v447_v11 = vadd.f32 %v446_v46, %v1008_v7  ;;  %v361_v12 = vand.u32 2147483648, %v1131_v43 }
  0x65   :  { %v453_v27 = vadd.f32 %v452_v55, %v451_v62  ;;  %v480_v9 = vrot.slane %v1152_v3, 3  ;;  %v516_v35 = vrot.slane %v1152_v3, 6  ;;  %v384_v36 = vsub.f32 %v382_v53, %v383_v8 }
  0x66   :  { %v442_v14 = vadd.f32 %v441_v6, %v1105_v1  ;;  %v448_v50 = vadd.f32 %v447_v11, %v1116_v57  ;;  %v1168_v10 = vadd.f32 %v1088_v48, %v977_v34  ;;  %v287_v4 = vsel %vm286_vm13, %v1090_v15, %v285_v21 }
  0x67   :  { %v454_v51 = vrot.slane %v453_v27, 2  ;;  %v481_v16 = vsel %vm104_vm1, %v479_v44, %v480_v9  ;;  %v517_v29 = vsel %vm141_vm2, %v515_v22, %v516_v35  ;;  %v1175_v17 = vmax.f32 %v384_v36, 0.0 }
  0x68   :  { %v443_v18 = vadd.f32 %v442_v14, %v1120_v58  ;;  %v449_v20 = vadd.f32 %v448_v50, %v1128_v13  ;;  %v483_v24 = vsel %vm75_vm0, %v481_v16, 0.0  ;;  %v519_v31 = vsel %vm75_vm0, %v517_v29, 0.0 }
  0x69   :  { %v804_v41 = vpop.eup %803  ;;  %v455_v48 = vadd.f32 %v454_v51, %v453_v27  ;;  %v484_v30 = vrot.slane %v483_v24, 4  ;;  %v290_v38 = vsel %vm288_vm14, %v289_v52, %v287_v4  ;;  %807 = vrsqrt.f32 %v1175_v17 }
  0x6a   :  { %v323_v34 = vmul.f32 %v804_v41, %v1108_v33  ;;  %v549_v5 = vrot.slane %v1152_v3, 1  ;;  %v1188_v39 = vadd.f32 %v1095_v19, %v979_v42  ;;  %v444_v8 = vadd.f32 %v443_v18, %v1136_v61 }
  0x6b   :  { %v806_v47 = vpop.eup %805  ;;  %v450_v28 = vadd.f32 %v449_v20, %v1149_v0  ;;  %v456_v40 = vrot.slane %v455_v48, 1  ;;  %vm388_vm6 = vcmp.eq.f32.partialorder %v1175_v17, inf  ;;  %v485_v25 = vadd.f32 %v484_v30, %v483_v24 }
  0x6c   :  { %v325_v56 = vsel %vm324_vm15, %v1108_v33, %v323_v34  ;;  %v357_v52 = vmul.f32 %v806_v47, %v1131_v43  ;;  %v520_v42 = vrot.slane %v519_v31, 4  ;;  %vm390_vm8 = vcmp.eq.f32.partialorder %v1175_v17, 0.0 }
  0x6d   :  { %v328_v15 = vsel %vm326_vm3, %v327_v63, %v325_v56  ;;  %v457_v19 = vadd.f32 %v456_v40, %v455_v48  ;;  %v458_v23 = vsel %vm75_vm0, %v444_v8, 0.0  ;;  %v492_v26 = vrot.slane %v444_v8, 3 }
  0x6e   :  { %v359_v62 = vsel %vm358_vm4, %v1131_v43, %v357_v52  ;;  %v459_v2 = vrot.slane %v458_v23, 4  ;;  %v486_v3 = vrot.slane %v485_v25, 2  ;;  %v493_v33 = vrot.slane %v450_v28, 3 }
  0x6f   :  { %v391_v63 = vand.u32 2147483648, %v1175_v17  ;;  %v393_v45 = vsel %vm206_vm7, %v290_v38, %v328_v15  ;;  %v521_v46 = vadd.f32 %v520_v42, %v519_v31  ;;  %v526_v54 = vrot.slane %v444_v8, 6 }
  0x70   :  { %v362_v55 = vsel %vm360_vm5, %v361_v12, %v359_v62  ;;  %v460_v44 = vadd.f32 %v459_v2, %v458_v23  ;;  %v487_v22 = vadd.f32 %v486_v3, %v485_v25  ;;  %v494_v21 = vsel %vm104_vm1, %v492_v26, %v493_v33 }
  0x71   :  { %v465_v53 = vmul.f32 0.020408163, %v457_v19  ;;  %v496_v6 = vsel %vm75_vm0, %v494_v21, 0.0  ;;  %v522_v11 = vrot.slane %v521_v46, 2  ;;  %v527_v27 = vrot.slane %v450_v28, 6  ;;  %v594_v21 = vld [vmem:[#allocation2 + $0xd8] sm:$0xff] }
  0x72   :  { %v461_v9 = vrot.slane %v460_v44, 2  ;;  %v488_v35 = vrot.slane %v487_v22, 1  ;;  %v497_v36 = vrot.slane %v496_v6, 4  ;;  %v551_v14 = vsel %vm75_vm0, %v549_v5, 0.0 }
  0x73   :  { %v523_v50 = vadd.f32 %v522_v11, %v521_v46  ;;  %v528_v4 = vsel %vm141_vm2, %v526_v54, %v527_v27  ;;  %v552_v51 = vrot.slane %v551_v14, 4  ;;  %v558_v43 = vrot.slane %v450_v28, 1  ;;  %v808_v12 = vpop.eup %807 }
  0x74   :  { %v462_v16 = vadd.f32 %v461_v9, %v460_v44  ;;  %v489_v29 = vadd.f32 %v488_v35, %v487_v22  ;;  %v498_v41 = vadd.f32 %v497_v36, %v496_v6  ;;  %v530_v18 = vsel %vm75_vm0, %v528_v4, 0.0  ;;  %v595_v4 = vld [vmem:[#allocation2 + $0xe0] sm:$0xff] }
  0x75   :  { %v387_v20 = vmul.f32 %v808_v12, %v1175_v17  ;;  %v524_v24 = vrot.slane %v523_v50, 1  ;;  %v531_v34 = vrot.slane %v530_v18, 4  ;;  %v553_v48 = vadd.f32 %v552_v51, %v551_v14 }
  0x76   :  { %v394_v30 = vsel %vm141_vm2, %v393_v45, %v362_v55  ;;  %v463_v31 = vrot.slane %v462_v16, 1  ;;  %v499_v38 = vrot.slane %v498_v41, 2  ;;  %v560_v5 = vsel %vm75_vm0, %v558_v43, 0.0 }
  0x77   :  { %v389_v47 = vsel %vm388_vm6, %v1175_v17, %v387_v20  ;;  %v525_v56 = vadd.f32 %v524_v24, %v523_v50  ;;  %v532_v8 = vadd.f32 %v531_v34, %v530_v18  ;;  %v554_v28 = vrot.slane %v553_v48, 2  ;;  %v593_v17 = vld [vmem:[#allocation2 + $0xd0] sm:$0xff] }
  0x78   :  { %v392_v40 = vsel %vm390_vm8, %v391_v63, %v389_v47  ;;  %v464_v15 = vadd.f32 %v463_v31, %v462_v16  ;;  %v467_v52 = vmul.f32 %v465_v53, %v465_v53  ;;  %v500_v25 = vadd.f32 %v499_v38, %v498_v41  ;;  %v597_v16 = vld [vmem:[#allocation2 + $0xf0] sm:$0xff] }
  0x79   :  { %v395_v42 = vsel %vm209_vm12, %v394_v30, %v392_v40  ;;  %v503_v19 = vmul.f32 0.020408163, %v489_v29  ;;  %v533_v23 = vrot.slane %v532_v8, 2  ;;  %v555_v26 = vadd.f32 %v554_v28, %v553_v48  ;;  %v598_v29 = vld [vmem:[#allocation2 + $0xf8] sm:$0xff] }
  0x7a   :  { %397 = vst [vmem:[#allocation5 + $0x4] sm:$0xf] %v395_v42  ;;  %v466_v62 = vmul.f32 0.020408163, %v464_v15  ;;  %v501_v2 = vrot.slane %v500_v25, 1  ;;  %v561_v3 = vrot.slane %v560_v5, 4  ;;  %v600_v33 = vadd.f32 %v1168_v10, %v1097_v32 }
  0x7b   :  { %v534_v45 = vadd.f32 %v533_v23, %v532_v8  ;;  %v537_v46 = vmul.f32 0.020408163, %v525_v56  ;;  %v556_v54 = vrot.slane %v555_v26, 1  ;;  %v606_v63 = vadd.f32 %v1188_v39, %v1099_v37  ;;  %v596_v37 = vld [vmem:[#allocation2 + $0xe8] sm:$0xff] }
  0x7c   :  { %v468_v55 = vsub.f32 %v466_v62, %v467_v52  ;;  %v502_v44 = vadd.f32 %v501_v2, %v500_v25  ;;  %v562_v22 = vadd.f32 %v561_v3, %v560_v5  ;;  %v601_v53 = vadd.f32 %v600_v33, %v1110_v49 }
  0x7d   :  { %v505_v6 = vmul.f32 %v503_v19, %v503_v19  ;;  %v535_v11 = vrot.slane %v534_v45, 1  ;;  %v557_v27 = vadd.f32 %v556_v54, %v555_v26  ;;  %v607_v9 = vadd.f32 %v606_v63, %v1123_v59 }
  0x7e   :  { %v1228_v35 = vmax.f32 %v468_v55, 0.0  ;;  %v504_v32 = vmul.f32 0.020408163, %v502_v44  ;;  %v563_v10 = vrot.slane %v562_v22, 2  ;;  %v602_v36 = vadd.f32 %v601_v53, %v593_v17 }
  0x7f   :  { %v536_v14 = vadd.f32 %v535_v11, %v534_v45  ;;  %v539_v50 = vmul.f32 %v537_v46, %v537_v46  ;;  %v608_v39 = vadd.f32 %v607_v9, %v594_v21  ;;  %v567_v51 = vmul.f32 0.020408163, %v557_v27 }
  0x80   :  { %809 = vrsqrt.f32 %v1228_v35  ;;  %v506_v43 = vsub.f32 %v504_v32, %v505_v6  ;;  %v564_v12 = vadd.f32 %v563_v10, %v562_v22  ;;  %v619_v41 = vmul.f32 %v593_v17, %v593_v17 }
  0x81   :  { %v538_v49 = vmul.f32 0.020408163, %v536_v14  ;;  %vm472_vm9 = vcmp.eq.f32.partialorder %v1228_v35, inf  ;;  %v603_v59 = vadd.f32 %v602_v36, %v595_v4  ;;  %v609_v18 = vadd.f32 %v608_v39, %v596_v37 }
  0x82   :  { %v620_v20 = vmul.f32 %v594_v21, %v594_v21  ;;  %v475_v24 = vand.u32 2147483648, %v1228_v35  ;;  %v1233_v34 = vmax.f32 %v506_v43, 0.0  ;;  %v565_v30 = vrot.slane %v564_v12, 1 }
  0x83   :  { %v540_v48 = vsub.f32 %v538_v49, %v539_v50  ;;  %vm474_vm10 = vcmp.eq.f32.partialorder %v1228_v35, 0.0  ;;  %v569_v31 = vmul.f32 %v567_v51, %v567_v51  ;;  %v604_v38 = vadd.f32 %v603_v59, %v597_v16 }
  0x84   :  { %v610_v5 = vadd.f32 %v609_v18, %v598_v29  ;;  %v625_v47 = vadd.f32 %v1105_v1, %v999_v60  ;;  %811 = vrsqrt.f32 %v1233_v34  ;;  %v621_v56 = vmul.f32 %v595_v4, %v595_v4 }
  0x85   :  { %v622_v8 = vmul.f32 %v596_v37, %v596_v37  ;;  %v623_v28 = vmul.f32 %v597_v16, %v597_v16  ;;  %v1239_v40 = vmax.f32 %v540_v48, 0.0  ;;  %v566_v15 = vadd.f32 %v565_v30, %v564_v12 }
  0x86   :  { %v626_v52 = vadd.f32 %v625_v47, %v1120_v58  ;;  %v631_v25 = vadd.f32 %v1116_v57, %v1008_v7  ;;  %v624_v42 = vmul.f32 %v598_v29, %v598_v29  ;;  %v637_v19 = vsel %vm75_vm0, %v604_v38, 0.0 }
  0x87   :  { %v665_v23 = vrot.slane %v604_v38, 3  ;;  %v666_v26 = vrot.slane %v610_v5, 3  ;;  %vm510_vm11 = vcmp.eq.f32.partialorder %v1233_v34, inf  ;;  %vm512_vm13 = vcmp.eq.f32.partialorder %v1233_v34, 0.0 }
  0x88   :  { %813 = vrsqrt.f32 %v1239_v40  ;;  %v701_v60 = vrot.slane %v604_v38, 6  ;;  %v568_v1 = vmul.f32 0.020408163, %v566_v15  ;;  %v627_v62 = vadd.f32 %v626_v52, %v1136_v61 }
  0x89   :  { %v632_v58 = vadd.f32 %v631_v25, %v1128_v13  ;;  %v638_v2 = vrot.slane %v637_v19, 4  ;;  %v513_v7 = vand.u32 2147483648, %v1233_v34  ;;  %v667_v57 = vsel %vm104_vm1, %v665_v23, %v666_v26 }
  0x8a   :  { %v810_v3 = vpop.eup %809  ;;  %v702_v33 = vrot.slane %v610_v5, 6  ;;  %v735_v45 = vrot.slane %v610_v5, 1  ;;  %v570_v54 = vsub.f32 %v568_v1, %v569_v31  ;;  %v628_v17 = vadd.f32 %v627_v62, %v619_v41 }
  0x8b   :  { %v471_v46 = vmul.f32 %v810_v3, %v1228_v35  ;;  %v633_v63 = vadd.f32 %v632_v58, %v1149_v0  ;;  %vm544_vm14 = vcmp.eq.f32.partialorder %v1239_v40, inf  ;;  %v639_v55 = vadd.f32 %v638_v2, %v637_v19 }
  0x8c   :  { %v669_v61 = vsel %vm75_vm0, %v667_v57, 0.0  ;;  %v703_v13 = vsel %vm141_vm2, %v701_v60, %v702_v33  ;;  %v1260_v22 = vmax.f32 %v570_v54, 0.0  ;;  %v629_v21 = vadd.f32 %v628_v17, %v621_v56 }
  0x8d   :  { %v473_v44 = vsel %vm472_vm9, %v1228_v35, %v471_v46  ;;  %v634_v53 = vadd.f32 %v633_v63, %v620_v20  ;;  %v640_v6 = vrot.slane %v639_v55, 2  ;;  %v670_v11 = vrot.slane %v669_v61, 4 }
  0x8e   :  { %v705_v27 = vsel %vm75_vm0, %v703_v13, 0.0  ;;  %v737_v0 = vsel %vm75_vm0, %v735_v45, 0.0  ;;  %v812_v9 = vpop.eup %811  ;;  %v476_v32 = vsel %vm474_vm10, %v475_v24, %v473_v44  ;;  %vm546_vm15 = vcmp.eq.f32.partialorder %v1239_v40, 0.0 }
  0x8f   :  { %v547_v10 = vand.u32 2147483648, %v1239_v40  ;;  %815 = vrsqrt.f32 %v1260_v22  ;;  %v509_v36 = vmul.f32 %v812_v9, %v1233_v34  ;;  %v630_v14 = vadd.f32 %v629_v21, %v623_v28 }
  0x90   :  { %v635_v50 = vadd.f32 %v634_v53, %v622_v8  ;;  %v641_v4 = vadd.f32 %v640_v6, %v639_v55  ;;  %vm574_vm3 = vcmp.eq.f32.partialorder %v1260_v22, inf  ;;  %v671_v37 = vadd.f32 %v670_v11, %v669_v61 }
  0x91   :  { %v706_v39 = vrot.slane %v705_v27, 4  ;;  %v738_v51 = vrot.slane %v737_v0, 4  ;;  %v511_v35 = vsel %vm510_vm11, %v1233_v34, %v509_v36  ;;  %v644_v16 = vsel %vm75_vm0, %v630_v14, 0.0 }
  0x92   :  { %v814_v43 = vpop.eup %813  ;;  %v636_v49 = vadd.f32 %v635_v50, %v624_v42  ;;  %v642_v12 = vrot.slane %v641_v4, 1  ;;  %v514_v29 = vsel %vm512_vm13, %v513_v7, %v511_v35  ;;  %v645_v59 = vrot.slane %v644_v16, 4 }
  0x93   :  { %v543_v41 = vmul.f32 %v814_v43, %v1239_v40  ;;  %v672_v18 = vrot.slane %v671_v37, 2  ;;  %v579_v20 = vsel %vm206_vm7, %v476_v32, %v514_v29  ;;  %v678_v48 = vrot.slane %v630_v14, 3 }
  0x94   :  { %v643_v24 = vadd.f32 %v642_v12, %v641_v4  ;;  %v679_v30 = vrot.slane %v636_v49, 3  ;;  %v646_v38 = vadd.f32 %v645_v59, %v644_v16  ;;  %v707_v47 = vadd.f32 %v706_v39, %v705_v27 }
  0x95   :  { %v545_v31 = vsel %vm544_vm14, %v1239_v40, %v543_v41  ;;  %v673_v5 = vadd.f32 %v672_v18, %v671_v37  ;;  %vm576_vm4 = vcmp.eq.f32.partialorder %v1260_v22, 0.0  ;;  %v712_v8 = vrot.slane %v630_v14, 6 }
  0x96   :  { %v548_v34 = vsel %vm546_vm15, %v547_v10, %v545_v31  ;;  %v680_v56 = vsel %vm104_vm1, %v678_v48, %v679_v30  ;;  %v647_v15 = vrot.slane %v646_v38, 2  ;;  %v577_v42 = vand.u32 2147483648, %v1260_v22 }
  0x97   :  { %v580_v28 = vsel %vm141_vm2, %v579_v20, %v548_v34  ;;  %v674_v52 = vrot.slane %v673_v5, 1  ;;  %v682_v25 = vsel %vm75_vm0, %v680_v56, 0.0  ;;  %v708_v23 = vrot.slane %v707_v47, 2 }
  0x98   :  { %v683_v19 = vrot.slane %v682_v25, 4  ;;  %v713_v26 = vrot.slane %v636_v49, 6  ;;  %v648_v1 = vadd.f32 %v647_v15, %v646_v38  ;;  %v651_v40 = vmul.f32 0.020408163, %v643_v24 }
  0x99   :  { %v816_v60 = vpop.eup %815  ;;  %v675_v62 = vadd.f32 %v674_v52, %v673_v5  ;;  %v739_v58 = vadd.f32 %v738_v51, %v737_v0  ;;  %v709_v7 = vadd.f32 %v708_v23, %v707_v47  ;;  %v744_v54 = vrot.slane %v636_v49, 1 }
  0x9a   :  { %v573_v2 = vmul.f32 %v816_v60, %v1260_v22  ;;  %v684_v3 = vadd.f32 %v683_v19, %v682_v25  ;;  %v714_v57 = vsel %vm141_vm2, %v712_v8, %v713_v26  ;;  %v649_v33 = vrot.slane %v648_v1, 1 }
  0x9b   :  { %v716_v45 = vsel %vm75_vm0, %v714_v57, 0.0  ;;  %v740_v46 = vrot.slane %v739_v58, 2  ;;  %v710_v55 = vrot.slane %v709_v7, 1  ;;  %v653_v21 = vmul.f32 %v651_v40, %v651_v40 }
  0x9c   :  { %v575_v17 = vsel %vm574_vm3, %v1260_v22, %v573_v2  ;;  %v685_v63 = vrot.slane %v684_v3, 2  ;;  %v717_v61 = vrot.slane %v716_v45, 4  ;;  %v650_v44 = vadd.f32 %v649_v33, %v648_v1 }
  0x9d   :  { %v578_v13 = vsel %vm576_vm4, %v577_v42, %v575_v17  ;;  %v741_v53 = vadd.f32 %v740_v46, %v739_v58  ;;  %v689_v27 = vmul.f32 0.020408163, %v675_v62  ;;  %v711_v32 = vadd.f32 %v710_v55, %v709_v7 }
  0x9e   :  { %v581_v6 = vsel %vm209_vm12, %v580_v28, %v578_v13  ;;  %v686_v11 = vadd.f32 %v685_v63, %v684_v3  ;;  %v718_v0 = vadd.f32 %v717_v61, %v716_v45  ;;  %v652_v9 = vmul.f32 0.020408163, %v650_v44 }
  0x9f   :  { %583 = vst [vmem:[#allocation5 + $0x8] sm:$0xf] %v581_v6  ;;  %v746_v10 = vsel %vm75_vm0, %v744_v54, 0.0  ;;  %v742_v50 = vrot.slane %v741_v53, 1  ;;  %v691_v39 = vmul.f32 %v689_v27, %v689_v27  ;;  %v723_v49 = vmul.f32 0.020408163, %v711_v32 }
  0xa0   :  { %v687_v36 = vrot.slane %v686_v11, 1  ;;  %v719_v14 = vrot.slane %v718_v0, 2  ;;  %v747_v4 = vrot.slane %v746_v10, 4  ;;  %v654_v37 = vsub.f32 %v652_v9, %v653_v21 }
  0xa1   :  { %v743_v29 = vadd.f32 %v742_v50, %v741_v53  ;;  %v725_v24 = vmul.f32 %v723_v49, %v723_v49 }
  0xa2   :  { %v688_v22 = vadd.f32 %v687_v36, %v686_v11  ;;  %v720_v51 = vadd.f32 %v719_v14, %v718_v0  ;;  %v748_v43 = vadd.f32 %v747_v4, %v746_v10  ;;  %v655_v35 = vmax.f32 %v654_v37, 0.0 }
  0xa3   :  { %v753_v38 = vmul.f32 0.020408163, %v743_v29 }
  0xa4   :  { %v690_v12 = vmul.f32 0.020408163, %v688_v22  ;;  %v721_v16 = vrot.slane %v720_v51, 1  ;;  %v749_v41 = vrot.slane %v748_v43, 2  ;;  %817 = vrsqrt.f32 %v655_v35 }
  0xa5   :  { %v755_v34 = vmul.f32 %v753_v38, %v753_v38  ;;  %vm658_vm0 = vcmp.eq.f32.partialorder %v655_v35, inf  ;;  %v661_v25 = vand.u32 2147483648, %v655_v35  ;;  %vm660_vm1 = vcmp.eq.f32.partialorder %v655_v35, 0.0 }
  0xa6   :  { %v692_v59 = vsub.f32 %v690_v12, %v691_v39  ;;  %v722_v18 = vadd.f32 %v721_v16, %v720_v51  ;;  %v750_v20 = vadd.f32 %v749_v41, %v748_v43 }
  0xa8   :  { %v693_v48 = vmax.f32 %v692_v59, 0.0  ;;  %v724_v30 = vmul.f32 0.020408163, %v722_v18  ;;  %v751_v31 = vrot.slane %v750_v20, 1 }
  0xaa   :  { %819 = vrsqrt.f32 %v693_v48  ;;  %v726_v5 = vsub.f32 %v724_v30, %v725_v24  ;;  %v752_v47 = vadd.f32 %v751_v31, %v750_v20  ;;  %vm696_vm5 = vcmp.eq.f32.partialorder %v693_v48, inf }
  0xab   :  { %v699_v26 = vand.u32 2147483648, %v693_v48  ;;  %vm698_vm6 = vcmp.eq.f32.partialorder %v693_v48, 0.0 }
  0xac   :  { %v727_v56 = vmax.f32 %v726_v5, 0.0  ;;  %v754_v8 = vmul.f32 0.020408163, %v752_v47 }
  0xae   :  { %v818_v28 = vpop.eup %817  ;;  %821 = vrsqrt.f32 %v727_v56  ;;  %v756_v52 = vsub.f32 %v754_v8, %v755_v34  ;;  %vm730_vm8 = vcmp.eq.f32.partialorder %v727_v56, inf  ;;  %v733_v2 = vand.u32 2147483648, %v727_v56 }
  0xaf   :  { %v657_v15 = vmul.f32 %v818_v28, %v655_v35  ;;  %vm732_vm9 = vcmp.eq.f32.partialorder %v727_v56, 0.0 }
  0xb0   :  { %v757_v42 = vmax.f32 %v756_v52, 0.0 }
  0xb1   :  { %v659_v19 = vsel %vm658_vm0, %v655_v35, %v657_v15 }
  0xb2   :  { %823 = vrsqrt.f32 %v757_v42  ;;  %v662_v1 = vsel %vm660_vm1, %v661_v25, %v659_v19  ;;  %vm760_vm10 = vcmp.eq.f32.partialorder %v757_v42, inf  ;;  %v763_v46 = vand.u32 2147483648, %v757_v42 }
  0xb3   :  { %vm762_vm11 = vcmp.eq.f32.partialorder %v757_v42, 0.0 }
  0xb4   :  { %v820_v23 = vpop.eup %819 }
  0xb5   :  { %v695_v60 = vmul.f32 %v820_v23, %v693_v48 }
  0xb7   :  { %v697_v40 = vsel %vm696_vm5, %v693_v48, %v695_v60 }
  0xb8   :  { %v700_v62 = vsel %vm698_vm6, %v699_v26, %v697_v40  ;;  %v822_v58 = vpop.eup %821 }
  0xb9   :  { %v765_v3 = vsel %vm206_vm7, %v662_v1, %v700_v62  ;;  %v729_v7 = vmul.f32 %v822_v58, %v727_v56 }
  0xbb   :  { %v731_v57 = vsel %vm730_vm8, %v727_v56, %v729_v7 }
  0xbc   :  { %v734_v33 = vsel %vm732_vm9, %v733_v2, %v731_v57  ;;  %v824_v45 = vpop.eup %823 }
  0xbd   :  { %v766_v54 = vsel %vm141_vm2, %v765_v3, %v734_v33  ;;  %v759_v17 = vmul.f32 %v824_v45, %v757_v42 }
  0xbf   :  { %v761_v63 = vsel %vm760_vm10, %v757_v42, %v759_v17 }
  0xc0   :  { %v764_v55 = vsel %vm762_vm11, %v763_v46, %v761_v63 }
  0xc1   :  { %v767_v61 = vsel %vm209_vm12, %v766_v54, %v764_v55 }
  0xc2   :  { %769 = vst [vmem:[#allocation5 + $0xc] sm:$0xf] %v767_v61 }
  0xc3   :  { %858 = shalt.err (!%p855_p12)
}
  0xc4   :  { %s859_s24 = scalar_lea.hbm %s1315_s1, 256 }
  0xc5   :  { %p860_p13 = scmp.ne.s32.totalorder %s1315_s1, %s859_s24  ;;  %p863_p0 = scmp.lt.u32.totalorder %s859_s24, %s1315_s1 }
  0xc7   :  { %p865_p1 = pnand %p863_p0, %p860_p13 }
  0xc9   :  { %868 = shalt.err (!%p865_p1)
}
  0xca   :  { %s877_s29 = smov 64   ;;  %s878_s30 = smov 4  }
  0xcb   :  { %781 = dma.vmem_to_hbm [thread:$0]  %s776_s20, 256, %s1315_s1, [#allocation4], %s877_s29, %s877_s29, %s878_s30  }
  0xcc   :  { %871 = dma.done.wait [#allocation4], 256  }
  0xcd   :  { %872 = vsyncadd [#allocation4], 4294967040 }
  0xce   :  { %785 = vsyncpa [#allocation3], 1 }
  0xcf   :  { %786 = vsyncpa [#allocation4], 1 }

</bundles_post_ra>
